<compile_context>
chip_gen: v7x
topology: tpu7x:2x2x1
jax: 0.10.0
libtpu: 0.0.40
codegen_flags: <defaults>
</compile_context>

<pallas_src>
import functools
import math

import jax
import jax.numpy as jnp
from jax.experimental import pallas as pl
from jax.experimental.pallas import tpu as pltpu


def sat_block_kernel(x_ref, pos_ref,
                     ln1w_ref, ln1b_ref, wqkv_ref, bqkv_ref,
                     wout_ref, bout_ref, ln2w_ref, ln2b_ref,
                     wfc_ref, bfc_ref, wpj_ref, bpj_ref,
                     y_ref, qkv_sc, attn_sc, *, num_heads, mlp_chunk=512):
    """One residual attention block for a single temporal index t.

    Attention mixes over the B rows of this tile (MultiheadAttention with
    batch_first=False mixes over the leading axis of the (B, T, D) input,
    independently per t).  1/sqrt(head_dim) is already folded into the Q
    columns of wqkv / bqkv by prepare_params().
    """
    f32, bf16 = jnp.float32, jnp.bfloat16
    B, D = x_ref.shape
    hd = D // num_heads

    def layernorm(v, w_ref, b_ref):
        mu = jnp.mean(v, axis=-1, keepdims=True)
        var = jnp.mean(jnp.square(v - mu), axis=-1, keepdims=True)
        return (v - mu) * jax.lax.rsqrt(var + 1e-5) * w_ref[...] + b_ref[...]

    # positional embedding for this t: plain (1, D) row broadcast
    x = x_ref[...].astype(f32) + pos_ref[...].astype(f32)               # (B, D)

    # ---- multi-head self-attention over the B rows ---------------------------
    h1 = layernorm(x, ln1w_ref, ln1b_ref)
    qkv_sc[...] = jnp.dot(h1.astype(bf16), wqkv_ref[...],
                          preferred_element_type=f32) + bqkv_ref[...]   # (B, 3D)

    # TODO(synk): on v6e/v7x, batch the heads through one dot_general with a
    # head batch dimension instead of this static per-head loop.
    for hh in range(num_heads):
        c = hh * hd
        qh = qkv_sc[:, c:c + hd]                                         # (B, hd)
        kh = qkv_sc[:, D + c:D + c + hd]
        vh = qkv_sc[:, 2 * D + c:2 * D + c + hd]
        s = jnp.einsum('bd,cd->bc', qh, kh,
                       preferred_element_type=f32)                       # (B, B)
        s = s - jnp.max(s, axis=-1, keepdims=True)
        p = jnp.exp(s)
        p = p * pl.reciprocal(jnp.sum(p, axis=-1, keepdims=True), approx=True)
        # fold the head concat into lane slices of one (B, D) bf16 scratch
        attn_sc[:, c:c + hd] = jnp.dot(
            p, vh, preferred_element_type=f32).astype(bf16)

    # single fused out-projection over all heads (contraction K = D)
    x = x + jnp.dot(attn_sc[...], wout_ref[...],
                    preferred_element_type=f32) + bout_ref[...]

    # ---- MLP (QuickGELU), tiled along the 4D hidden axis ---------------------
    h2 = layernorm(x, ln2w_ref, ln2b_ref).astype(bf16)
    D4 = wfc_ref.shape[1]
    chunk = min(D4, mlp_chunk)
    m = jnp.zeros((B, D), f32)
    for j in range(0, D4, chunk):
        u = jnp.dot(h2, wfc_ref[:, j:j + chunk],
                    preferred_element_type=f32) + bfc_ref[:, j:j + chunk]
        u = u * jax.nn.sigmoid(1.702 * u)                                # QuickGELU
        m = m + jnp.dot(u.astype(bf16), wpj_ref[j:j + chunk, :],
                        preferred_element_type=f32)
    x = x + m + bpj_ref[...]

    y_ref[...] = x.astype(y_ref.dtype)


def sat_aggregate_kernel(y_mos_ref, x_fus_ref, alpha_ref, o_ref, *, n_tok):
    """out[b] = (sum_t y_mos[t,b] + sum_f alpha * x_fus[b,f]) / n_tok."""
    f32 = jnp.float32
    mos_sum = jnp.sum(y_mos_ref[...].astype(f32), axis=0)                # (B, D)
    fus_sum = jnp.sum(x_fus_ref[...].astype(f32) * alpha_ref[...], axis=1)
    o_ref[...] = ((mos_sum + fus_sum) * (1.0 / n_tok)).astype(o_ref.dtype)


def init_params(key, T, D):
    # TODO(synk): trunc_normal_ approximated by plain normal * std (init only).
    ks = jax.random.split(key, 5)
    std = 0.02
    return {
        'pos':  jax.random.normal(ks[0], (T, D), jnp.float32) * std,
        'wqkv': jax.random.normal(ks[1], (3 * D, D), jnp.float32) * std,   # in_proj_weight
        'bqkv': jnp.zeros((3 * D,), jnp.float32),
        'wout': jax.random.normal(ks[2], (D, D), jnp.float32) * std,       # out_proj.weight
        'bout': jnp.zeros((D,), jnp.float32),
        'ln1w': jnp.ones((D,), jnp.float32), 'ln1b': jnp.zeros((D,), jnp.float32),
        'ln2w': jnp.ones((D,), jnp.float32), 'ln2b': jnp.zeros((D,), jnp.float32),
        'wfc':  jax.random.normal(ks[3], (4 * D, D), jnp.float32) * std,   # mlp.c_fc
        'bfc':  jnp.zeros((4 * D,), jnp.float32),
        'wpj':  jax.random.normal(ks[4], (D, 4 * D), jnp.float32) * std,   # mlp.c_proj
        'bpj':  jnp.zeros((D,), jnp.float32),
        'alpha': jnp.ones((D,), jnp.float32),
    }


def prepare_params(params, num_heads):
    """One-time parameter transform, hoisted out of the per-step path:
    fold 1/sqrt(head_dim) into the Q rows of in_proj (weight AND bias),
    transpose weights to (in, out) and cast matmul weights to bf16."""
    T, D = params['pos'].shape
    hd = D // num_heads
    scale = 1.0 / math.sqrt(hd)
    bf16 = jnp.bfloat16
    row = lambda v: v.reshape(1, -1)
    wqkv = params['wqkv'].at[:D, :].multiply(scale)
    bqkv = params['bqkv'].at[:D].multiply(scale)
    return {
        'pos':  params['pos'].reshape(T, 1, D),
        'ln1w': row(params['ln1w']), 'ln1b': row(params['ln1b']),
        'wqkv': wqkv.T.astype(bf16), 'bqkv': row(bqkv),
        'wout': params['wout'].T.astype(bf16), 'bout': row(params['bout']),
        'ln2w': row(params['ln2w']), 'ln2b': row(params['ln2b']),
        'wfc':  params['wfc'].T.astype(bf16), 'bfc': row(params['bfc']),
        'wpj':  params['wpj'].T.astype(bf16), 'bpj': row(params['bpj']),
        'alpha': params['alpha'].reshape(1, 1, D),
    }


def sat_forward(x, prep, T, num_heads, *, vmem_limit_bytes=None):
    B, N, D = x.shape
    D4 = 4 * D

    # seq-first (T, B, D) tile layout for the t grid; fusion tokens unchanged.
    # TODO(synk): fold this transpose into the x BlockSpec (block (B, 1, D) on
    # the original (B, N, D) layout) to avoid one HBM read+write of the mos
    # activations per call at production B.
    x_mos = jnp.transpose(x[:, :T, :], (1, 0, 2))
    x_fus = x[:, T:, :]

    full = lambda shape: pl.BlockSpec(shape, lambda t, _s=shape: (0,) * len(_s))

    block = functools.partial(sat_block_kernel, num_heads=num_heads)
    y_mos = pl.pallas_call(
        block,
        out_shape=jax.ShapeDtypeStruct((T, B, D), jnp.float32),
        grid_spec=pltpu.PrefetchScalarGridSpec(
            num_scalar_prefetch=0,
            grid=(T,),
            in_specs=[
                pl.BlockSpec((None, B, D), lambda t: (t, 0, 0)),    # x_mos[t]
                pl.BlockSpec((None, 1, D), lambda t: (t, 0, 0)),    # pos[t]
                full((1, D)), full((1, D)),                         # ln1 w, b
                full((D, 3 * D)), full((1, 3 * D)),                 # wqkv, bqkv
                full((D, D)), full((1, D)),                         # wout, bout
                full((1, D)), full((1, D)),                         # ln2 w, b
                full((D, D4)), full((1, D4)),                       # wfc, bfc
                full((D4, D)), full((1, D)),                        # wpj, bpj
            ],
            out_specs=pl.BlockSpec((None, B, D), lambda t: (t, 0, 0)),
            scratch_shapes=[pltpu.VMEM((B, 3 * D), jnp.float32),    # staged qkv
                            pltpu.VMEM((B, D), jnp.bfloat16)],      # head concat
        ),
        compiler_params=pltpu.CompilerParams(
            # independent per-t blocks: v7x's two TensorCores split the grid
            dimension_semantics=("parallel",),
            # TODO(synk): for production shapes set vmem_limit_bytes explicitly
            # (v5e's 16 MiB scoped default is hit first; use roughly half-size
            # row tiles on v7x's 64 MiB VMEM).
            vmem_limit_bytes=vmem_limit_bytes),
    )(x_mos, prep['pos'],
      prep['ln1w'], prep['ln1b'], prep['wqkv'], prep['bqkv'],
      prep['wout'], prep['bout'], prep['ln2w'], prep['ln2b'],
      prep['wfc'], prep['bfc'], prep['wpj'], prep['bpj'])

    agg = functools.partial(sat_aggregate_kernel, n_tok=N)
    return pl.pallas_call(
        agg,
        out_shape=jax.ShapeDtypeStruct((B, D), x.dtype),
        in_specs=[pl.BlockSpec(memory_space=pltpu.MemorySpace.VMEM)] * 3,
        out_specs=pl.BlockSpec(memory_space=pltpu.MemorySpace.VMEM),
    )(y_mos, x_fus, prep['alpha'])


def reference(x, p, T, num_heads):
    """Pure-JAX f32 mirror of the PyTorch forward (for verification)."""
    B, N, D = x.shape
    hd = D // num_heads

    def ln(v, w, b):
        mu = v.mean(-1, keepdims=True)
        var = ((v - mu) ** 2).mean(-1, keepdims=True)
        return (v - mu) / jnp.sqrt(var + 1e-5) * w + b

    xm = jnp.transpose(x[:, :T, :], (1, 0, 2)) + p['pos'][:, None, :]   # (T, B, D)
    h = ln(xm, p['ln1w'], p['ln1b'])
    qkv = h @ p['wqkv'].T + p['bqkv']
    q, k, v = qkv[..., :D], qkv[..., D:2 * D], qkv[..., 2 * D:]
    q = q.reshape(T, B, num_heads, hd) / jnp.sqrt(hd)
    k = k.reshape(T, B, num_heads, hd)
    v = v.reshape(T, B, num_heads, hd)
    s = jnp.einsum('tbhd,tchd->thbc', q, k)
    pr = jax.nn.softmax(s, axis=-1)
    ao = jnp.einsum('thbc,tchd->tbhd', pr, v).reshape(T, B, D)
    xm = xm + (ao @ p['wout'].T + p['bout'])
    h2 = ln(xm, p['ln2w'], p['ln2b'])
    u = h2 @ p['wfc'].T + p['bfc']
    u = u * jax.nn.sigmoid(1.702 * u)
    xm = xm + (u @ p['wpj'].T + p['bpj'])
    fus_sum = (x[:, T:, :] * p['alpha']).sum(1)
    mos_sum = jnp.transpose(xm, (1, 0, 2)).sum(1)
    return (fus_sum + mos_sum) / N


if __name__ == "__main__":
    B, N, T, D = 2, 8, 4, 128          # D=128 -> heads = D // 64 = 2
    num_heads = D // 64

    key = jax.random.PRNGKey(0)
    kx, kp = jax.random.split(key)
    x = jax.random.normal(kx, (B, N, D), jnp.float32)
    params = init_params(kp, T, D)

    # one-time parameter prep (outside the jitted per-step path)
    prep = prepare_params(params, num_heads)

    fwd = jax.jit(sat_forward, static_argnums=(2, 3))
    out = jax.block_until_ready(fwd(x, prep, T, num_heads))

    ref = reference(x, params, T, num_heads)
    err = float(jnp.max(jnp.abs(out - ref)))
    assert out.shape == (B, D)
    # bf16 projections + approx reciprocal loosen tolerance vs. pure-f32 reference
    assert err < 2e-2, f"max err {err}"
    print("KERNEL_OK")
</pallas_src>

<mosaic_0001>
module attributes {stable_mosaic.version = 11 : i64} {
  func.func @sat_aggregate_kernel(%arg0: memref<4x2x128xf32, #tpu.memory_space<vmem>>, %arg1: memref<2x4x128xf32, #tpu.memory_space<vmem>>, %arg2: memref<1x1x128xf32, #tpu.memory_space<vmem>>, %arg3: memref<2x128xf32, #tpu.memory_space<vmem>>) attributes {dimension_semantics = [], scalar_prefetch = 0 : i64, scratch_operands = 0 : i64, tpu.core_type = #tpu.core_type<tc>} {
    %c0 = arith.constant 0 : index
    %c0_0 = arith.constant 0 : index
    %c0_1 = arith.constant 0 : index
    %0 = vector.load %arg0[%c0, %c0_0, %c0_1] : memref<4x2x128xf32, #tpu.memory_space<vmem>>, vector<4x2x128xf32>
    %cst = arith.constant dense<0.000000e+00> : vector<2x128xf32>
    %1 = vector.multi_reduction <add>, %0, %cst [0] : vector<4x2x128xf32> to vector<2x128xf32>
    %c0_2 = arith.constant 0 : index
    %c0_3 = arith.constant 0 : index
    %c0_4 = arith.constant 0 : index
    %2 = vector.load %arg1[%c0_2, %c0_3, %c0_4] : memref<2x4x128xf32, #tpu.memory_space<vmem>>, vector<2x4x128xf32>
    %c0_5 = arith.constant 0 : index
    %c0_6 = arith.constant 0 : index
    %c0_7 = arith.constant 0 : index
    %3 = vector.load %arg2[%c0_5, %c0_6, %c0_7] : memref<1x1x128xf32, #tpu.memory_space<vmem>>, vector<1x1x128xf32>
    %4 = vector.broadcast %3 : vector<1x1x128xf32> to vector<2x4x128xf32>
    %5 = arith.mulf %2, %4 : vector<2x4x128xf32>
    %cst_8 = arith.constant dense<0.000000e+00> : vector<2x128xf32>
    %6 = vector.multi_reduction <add>, %5, %cst_8 [1] : vector<2x4x128xf32> to vector<2x128xf32>
    %7 = arith.addf %1, %6 : vector<2x128xf32>
    %cst_9 = arith.constant 1.250000e-01 : f32
    %8 = vector.broadcast %cst_9 : f32 to vector<2x128xf32>
    %9 = arith.mulf %7, %8 : vector<2x128xf32>
    %c0_10 = arith.constant 0 : index
    %c0_11 = arith.constant 0 : index
    %10 = vector.load %arg3[%c0_10, %c0_11] : memref<2x128xf32, #tpu.memory_space<vmem>>, vector<2x128xf32>
    tpu.vector_store %arg3[%c0_10, %c0_11], %9 {strides = array<i32>} : memref<2x128xf32, #tpu.memory_space<vmem>>, vector<2x128xf32>,
    return
  }
}

module attributes {stable_mosaic.version = 11 : i64} {
  func.func @sat_block_kernel(%arg0: i32, %arg1: memref<1x2x128xf32, #tpu.memory_space<vmem>>, %arg2: memref<1x1x128xf32, #tpu.memory_space<vmem>>, %arg3: memref<1x128xf32, #tpu.memory_space<vmem>>, %arg4: memref<1x128xf32, #tpu.memory_space<vmem>>, %arg5: memref<128x384xbf16, #tpu.memory_space<vmem>>, %arg6: memref<1x384xf32, #tpu.memory_space<vmem>>, %arg7: memref<128x128xbf16, #tpu.memory_space<vmem>>, %arg8: memref<1x128xf32, #tpu.memory_space<vmem>>, %arg9: memref<1x128xf32, #tpu.memory_space<vmem>>, %arg10: memref<1x128xf32, #tpu.memory_space<vmem>>, %arg11: memref<128x512xbf16, #tpu.memory_space<vmem>>, %arg12: memref<1x512xf32, #tpu.memory_space<vmem>>, %arg13: memref<512x128xbf16, #tpu.memory_space<vmem>>, %arg14: memref<1x128xf32, #tpu.memory_space<vmem>>, %arg15: memref<1x2x128xf32, #tpu.memory_space<vmem>>, %arg16: memref<2x384xf32, #tpu.memory_space<vmem>>, %arg17: memref<2x128xbf16, #tpu.memory_space<vmem>>) attributes {dimension_semantics = [#tpu.dimension_semantics<parallel>], iteration_bounds = array<i64: 4>, scalar_prefetch = 0 : i64, scratch_operands = 2 : i64, tpu.core_type = #tpu.core_type<tc>, window_params = [{transform_indices = @transform_0, window_bounds = array<i64: 1, 2, 128>}, {transform_indices = @transform_1, window_bounds = array<i64: 1, 1, 128>}, {pipeline_mode = #tpu.pipeline_mode<synchronous>, transform_indices = @transform_2, window_bounds = array<i64: 1, 128>}, {pipeline_mode = #tpu.pipeline_mode<synchronous>, transform_indices = @transform_3, window_bounds = array<i64: 1, 128>}, {pipeline_mode = #tpu.pipeline_mode<synchronous>, transform_indices = @transform_4, window_bounds = array<i64: 128, 384>}, {pipeline_mode = #tpu.pipeline_mode<synchronous>, transform_indices = @transform_5, window_bounds = array<i64: 1, 384>}, {pipeline_mode = #tpu.pipeline_mode<synchronous>, transform_indices = @transform_6, window_bounds = array<i64: 128, 128>}, {pipeline_mode = #tpu.pipeline_mode<synchronous>, transform_indices = @transform_7, window_bounds = array<i64: 1, 128>}, {pipeline_mode = #tpu.pipeline_mode<synchronous>, transform_indices = @transform_8, window_bounds = array<i64: 1, 128>}, {pipeline_mode = #tpu.pipeline_mode<synchronous>, transform_indices = @transform_9, window_bounds = array<i64: 1, 128>}, {pipeline_mode = #tpu.pipeline_mode<synchronous>, transform_indices = @transform_10, window_bounds = array<i64: 128, 512>}, {pipeline_mode = #tpu.pipeline_mode<synchronous>, transform_indices = @transform_11, window_bounds = array<i64: 1, 512>}, {pipeline_mode = #tpu.pipeline_mode<synchronous>, transform_indices = @transform_12, window_bounds = array<i64: 512, 128>}, {pipeline_mode = #tpu.pipeline_mode<synchronous>, transform_indices = @transform_13, window_bounds = array<i64: 1, 128>}, {transform_indices = @transform_14, window_bounds = array<i64: 1, 2, 128>}]} {
    %c0 = arith.constant 0 : index
    %c0_0 = arith.constant 0 : index
    %c0_1 = arith.constant 0 : index
    %0 = vector.load %arg1[%c0, %c0_0, %c0_1] : memref<1x2x128xf32, #tpu.memory_space<vmem>>, vector<1x2x128xf32>
    %1 = vector.shape_cast %0 : vector<1x2x128xf32> to vector<2x128xf32>
    %c0_2 = arith.constant 0 : index
    %c0_3 = arith.constant 0 : index
    %c0_4 = arith.constant 0 : index
    %2 = vector.load %arg2[%c0_2, %c0_3, %c0_4] : memref<1x1x128xf32, #tpu.memory_space<vmem>>, vector<1x1x128xf32>
    %3 = vector.shape_cast %2 : vector<1x1x128xf32> to vector<1x128xf32>
    %4 = vector.broadcast %3 : vector<1x128xf32> to vector<2x128xf32>
    %5 = arith.addf %1, %4 : vector<2x128xf32>
    %cst = arith.constant dense<0.000000e+00> : vector<2xf32>
    %6 = vector.multi_reduction <add>, %5, %cst [1] : vector<2x128xf32> to vector<2xf32>
    %7 = vector.shape_cast %6 : vector<2xf32> to vector<2x1xf32>
    %cst_5 = arith.constant 1.280000e+02 : f32
    %8 = vector.broadcast %cst_5 : f32 to vector<2x1xf32>
    %9 = arith.divf %7, %8 : vector<2x1xf32>
    %10 = vector.broadcast %9 : vector<2x1xf32> to vector<2x128xf32>
    %11 = arith.subf %5, %10 : vector<2x128xf32>
    %12 = arith.mulf %11, %11 : vector<2x128xf32>
    %cst_6 = arith.constant dense<0.000000e+00> : vector<2xf32>
    %13 = vector.multi_reduction <add>, %12, %cst_6 [1] : vector<2x128xf32> to vector<2xf32>
    %14 = vector.shape_cast %13 : vector<2xf32> to vector<2x1xf32>
    %cst_7 = arith.constant 1.280000e+02 : f32
    %15 = vector.broadcast %cst_7 : f32 to vector<2x1xf32>
    %16 = arith.divf %14, %15 : vector<2x1xf32>
    %17 = vector.broadcast %9 : vector<2x1xf32> to vector<2x128xf32>
    %18 = arith.subf %5, %17 : vector<2x128xf32>
    %cst_8 = arith.constant 9.99999974E-6 : f32
    %19 = vector.broadcast %cst_8 : f32 to vector<2x1xf32>
    %20 = arith.addf %16, %19 : vector<2x1xf32>
    %21 = math.rsqrt %20 : vector<2x1xf32>
    %22 = vector.broadcast %21 : vector<2x1xf32> to vector<2x128xf32>
    %23 = arith.mulf %18, %22 : vector<2x128xf32>
    %c0_9 = arith.constant 0 : index
    %c0_10 = arith.constant 0 : index
    %24 = vector.load %arg3[%c0_9, %c0_10] : memref<1x128xf32, #tpu.memory_space<vmem>>, vector<1x128xf32>
    %25 = vector.broadcast %24 : vector<1x128xf32> to vector<2x128xf32>
    %26 = arith.mulf %23, %25 : vector<2x128xf32>
    %c0_11 = arith.constant 0 : index
    %c0_12 = arith.constant 0 : index
    %27 = vector.load %arg4[%c0_11, %c0_12] : memref<1x128xf32, #tpu.memory_space<vmem>>, vector<1x128xf32>
    %28 = vector.broadcast %27 : vector<1x128xf32> to vector<2x128xf32>
    %29 = arith.addf %26, %28 : vector<2x128xf32>
    %30 = arith.truncf %29 : vector<2x128xf32> to vector<2x128xbf16>
    %c0_13 = arith.constant 0 : index
    %c0_14 = arith.constant 0 : index
    %31 = vector.load %arg5[%c0_13, %c0_14] : memref<128x384xbf16, #tpu.memory_space<vmem>>, vector<128x384xbf16>
    %cst_15 = arith.constant dense<0.000000e+00> : vector<2x384xf32>
    %32 = tpu.matmul %30, %31, %cst_15 {dimension_numbers = #tpu.dot_dimension_numbers<[1], [0], [0], [1], [0, 0, 1, 1], [], []>} : vector<2x128xbf16>, vector<128x384xbf16>, vector<2x384xf32> -> vector<2x384xf32>
    %c0_16 = arith.constant 0 : index
    %c0_17 = arith.constant 0 : index
    %33 = vector.load %arg6[%c0_16, %c0_17] : memref<1x384xf32, #tpu.memory_space<vmem>>, vector<1x384xf32>
    %34 = vector.broadcast %33 : vector<1x384xf32> to vector<2x384xf32>
    %35 = arith.addf %32, %34 : vector<2x384xf32>
    %c0_18 = arith.constant 0 : index
    %c0_19 = arith.constant 0 : index
    %36 = vector.load %arg16[%c0_18, %c0_19] : memref<2x384xf32, #tpu.memory_space<vmem>>, vector<2x384xf32>
    tpu.vector_store %arg16[%c0_18, %c0_19], %35 {strides = array<i32>} : memref<2x384xf32, #tpu.memory_space<vmem>>, vector<2x384xf32>,
    %c0_20 = arith.constant 0 : index
    %c0_21 = arith.constant 0 : index
    %37 = vector.load %arg16[%c0_20, %c0_21] : memref<2x384xf32, #tpu.memory_space<vmem>>, vector<2x64xf32>
    %c0_22 = arith.constant 0 : index
    %c128 = arith.constant 128 : index
    %38 = vector.load %arg16[%c0_22, %c128] : memref<2x384xf32, #tpu.memory_space<vmem>>, vector<2x64xf32>
    %c0_23 = arith.constant 0 : index
    %c256 = arith.constant 256 : index
    %39 = vector.load %arg16[%c0_23, %c256] : memref<2x384xf32, #tpu.memory_space<vmem>>, vector<2x64xf32>
    "tpu.trace_start"() <{level = 10 : i32, message = "bd,cd->bc"}> : () -> ()
    %cst_24 = arith.constant dense<0.000000e+00> : vector<2x2xf32>
    %40 = tpu.matmul %37, %38, %cst_24 {dimension_numbers = #tpu.dot_dimension_numbers<[1], [1], [0], [0], [0, 0, 1, 0], [], []>} : vector<2x64xf32>, vector<2x64xf32>, vector<2x2xf32> -> vector<2x2xf32>
    "tpu.trace_stop"() : () -> ()
    %cst_25 = arith.constant dense<0xFF800000> : vector<2xf32>
    %41 = vector.multi_reduction <maximumf>, %40, %cst_25 [1] : vector<2x2xf32> to vector<2xf32>
    %42 = vector.shape_cast %41 : vector<2xf32> to vector<2x1xf32>
    %43 = vector.broadcast %42 : vector<2x1xf32> to vector<2x2xf32>
    %44 = arith.subf %40, %43 : vector<2x2xf32>
    %45 = math.exp %44 : vector<2x2xf32>
    %cst_26 = arith.constant dense<0.000000e+00> : vector<2xf32>
    %46 = vector.multi_reduction <add>, %45, %cst_26 [1] : vector<2x2xf32> to vector<2xf32>
    %47 = vector.shape_cast %46 : vector<2xf32> to vector<2x1xf32>
    %48 = tpu.reciprocal %47 {approx = true} : vector<2x1xf32> -> vector<2x1xf32>
    %49 = vector.broadcast %48 : vector<2x1xf32> to vector<2x2xf32>
    %50 = arith.mulf %45, %49 : vector<2x2xf32>
    %cst_27 = arith.constant dense<0.000000e+00> : vector<2x64xf32>
    %51 = tpu.matmul %50, %39, %cst_27 {dimension_numbers = #tpu.dot_dimension_numbers<[1], [0], [0], [1], [0, 0, 1, 1], [], []>} : vector<2x2xf32>, vector<2x64xf32>, vector<2x64xf32> -> vector<2x64xf32>
    %52 = arith.truncf %51 : vector<2x64xf32> to vector<2x64xbf16>
    %c0_28 = arith.constant 0 : index
    %c0_29 = arith.constant 0 : index
    %53 = vector.load %arg17[%c0_28, %c0_29] : memref<2x128xbf16, #tpu.memory_space<vmem>>, vector<2x64xbf16>
    tpu.vector_store %arg17[%c0_28, %c0_29], %52 {strides = array<i32>} : memref<2x128xbf16, #tpu.memory_space<vmem>>, vector<2x64xbf16>,
    %c0_30 = arith.constant 0 : index
    %c64 = arith.constant 64 : index
    %54 = vector.load %arg16[%c0_30, %c64] : memref<2x384xf32, #tpu.memory_space<vmem>>, vector<2x64xf32>
    %c0_31 = arith.constant 0 : index
    %c192 = arith.constant 192 : index
    %55 = vector.load %arg16[%c0_31, %c192] : memref<2x384xf32, #tpu.memory_space<vmem>>, vector<2x64xf32>
    %c0_32 = arith.constant 0 : index
    %c320 = arith.constant 320 : index
    %56 = vector.load %arg16[%c0_32, %c320] : memref<2x384xf32, #tpu.memory_space<vmem>>, vector<2x64xf32>
    "tpu.trace_start"() <{level = 10 : i32, message = "bd,cd->bc"}> : () -> ()
    %cst_33 = arith.constant dense<0.000000e+00> : vector<2x2xf32>
    %57 = tpu.matmul %54, %55, %cst_33 {dimension_numbers = #tpu.dot_dimension_numbers<[1], [1], [0], [0], [0, 0, 1, 0], [], []>} : vector<2x64xf32>, vector<2x64xf32>, vector<2x2xf32> -> vector<2x2xf32>
    "tpu.trace_stop"() : () -> ()
    %cst_34 = arith.constant dense<0xFF800000> : vector<2xf32>
    %58 = vector.multi_reduction <maximumf>, %57, %cst_34 [1] : vector<2x2xf32> to vector<2xf32>
    %59 = vector.shape_cast %58 : vector<2xf32> to vector<2x1xf32>
    %60 = vector.broadcast %59 : vector<2x1xf32> to vector<2x2xf32>
    %61 = arith.subf %57, %60 : vector<2x2xf32>
    %62 = math.exp %61 : vector<2x2xf32>
    %cst_35 = arith.constant dense<0.000000e+00> : vector<2xf32>
    %63 = vector.multi_reduction <add>, %62, %cst_35 [1] : vector<2x2xf32> to vector<2xf32>
    %64 = vector.shape_cast %63 : vector<2xf32> to vector<2x1xf32>
    %65 = tpu.reciprocal %64 {approx = true} : vector<2x1xf32> -> vector<2x1xf32>
    %66 = vector.broadcast %65 : vector<2x1xf32> to vector<2x2xf32>
    %67 = arith.mulf %62, %66 : vector<2x2xf32>
    %cst_36 = arith.constant dense<0.000000e+00> : vector<2x64xf32>
    %68 = tpu.matmul %67, %56, %cst_36 {dimension_numbers = #tpu.dot_dimension_numbers<[1], [0], [0], [1], [0, 0, 1, 1], [], []>} : vector<2x2xf32>, vector<2x64xf32>, vector<2x64xf32> -> vector<2x64xf32>
    %69 = arith.truncf %68 : vector<2x64xf32> to vector<2x64xbf16>
    %c0_37 = arith.constant 0 : index
    %c64_38 = arith.constant 64 : index
    %70 = vector.load %arg17[%c0_37, %c64_38] : memref<2x128xbf16, #tpu.memory_space<vmem>>, vector<2x64xbf16>
    tpu.vector_store %arg17[%c0_37, %c64_38], %69 {strides = array<i32>} : memref<2x128xbf16, #tpu.memory_space<vmem>>, vector<2x64xbf16>,
    %c0_39 = arith.constant 0 : index
    %c0_40 = arith.constant 0 : index
    %71 = vector.load %arg17[%c0_39, %c0_40] : memref<2x128xbf16, #tpu.memory_space<vmem>>, vector<2x128xbf16>
    %c0_41 = arith.constant 0 : index
    %c0_42 = arith.constant 0 : index
    %72 = vector.load %arg7[%c0_41, %c0_42] : memref<128x128xbf16, #tpu.memory_space<vmem>>, vector<128x128xbf16>
    %cst_43 = arith.constant dense<0.000000e+00> : vector<2x128xf32>
    %73 = tpu.matmul %71, %72, %cst_43 {dimension_numbers = #tpu.dot_dimension_numbers<[1], [0], [0], [1], [0, 0, 1, 1], [], []>} : vector<2x128xbf16>, vector<128x128xbf16>, vector<2x128xf32> -> vector<2x128xf32>
    %74 = arith.addf %5, %73 : vector<2x128xf32>
    %c0_44 = arith.constant 0 : index
    %c0_45 = arith.constant 0 : index
    %75 = vector.load %arg8[%c0_44, %c0_45] : memref<1x128xf32, #tpu.memory_space<vmem>>, vector<1x128xf32>
    %76 = vector.broadcast %75 : vector<1x128xf32> to vector<2x128xf32>
    %77 = arith.addf %74, %76 : vector<2x128xf32>
    %cst_46 = arith.constant dense<0.000000e+00> : vector<2xf32>
    %78 = vector.multi_reduction <add>, %77, %cst_46 [1] : vector<2x128xf32> to vector<2xf32>
    %79 = vector.shape_cast %78 : vector<2xf32> to vector<2x1xf32>
    %cst_47 = arith.constant 1.280000e+02 : f32
    %80 = vector.broadcast %cst_47 : f32 to vector<2x1xf32>
    %81 = arith.divf %79, %80 : vector<2x1xf32>
    %82 = vector.broadcast %81 : vector<2x1xf32> to vector<2x128xf32>
    %83 = arith.subf %77, %82 : vector<2x128xf32>
    %84 = arith.mulf %83, %83 : vector<2x128xf32>
    %cst_48 = arith.constant dense<0.000000e+00> : vector<2xf32>
    %85 = vector.multi_reduction <add>, %84, %cst_48 [1] : vector<2x128xf32> to vector<2xf32>
    %86 = vector.shape_cast %85 : vector<2xf32> to vector<2x1xf32>
    %cst_49 = arith.constant 1.280000e+02 : f32
    %87 = vector.broadcast %cst_49 : f32 to vector<2x1xf32>
    %88 = arith.divf %86, %87 : vector<2x1xf32>
    %89 = vector.broadcast %81 : vector<2x1xf32> to vector<2x128xf32>
    %90 = arith.subf %77, %89 : vector<2x128xf32>
    %cst_50 = arith.constant 9.99999974E-6 : f32
    %91 = vector.broadcast %cst_50 : f32 to vector<2x1xf32>
    %92 = arith.addf %88, %91 : vector<2x1xf32>
    %93 = math.rsqrt %92 : vector<2x1xf32>
    %94 = vector.broadcast %93 : vector<2x1xf32> to vector<2x128xf32>
    %95 = arith.mulf %90, %94 : vector<2x128xf32>
    %c0_51 = arith.constant 0 : index
    %c0_52 = arith.constant 0 : index
    %96 = vector.load %arg9[%c0_51, %c0_52] : memref<1x128xf32, #tpu.memory_space<vmem>>, vector<1x128xf32>
    %97 = vector.broadcast %96 : vector<1x128xf32> to vector<2x128xf32>
    %98 = arith.mulf %95, %97 : vector<2x128xf32>
    %c0_53 = arith.constant 0 : index
    %c0_54 = arith.constant 0 : index
    %99 = vector.load %arg10[%c0_53, %c0_54] : memref<1x128xf32, #tpu.memory_space<vmem>>, vector<1x128xf32>
    %100 = vector.broadcast %99 : vector<1x128xf32> to vector<2x128xf32>
    %101 = arith.addf %98, %100 : vector<2x128xf32>
    %102 = arith.truncf %101 : vector<2x128xf32> to vector<2x128xbf16>
    %cst_55 = arith.constant 0.000000e+00 : f32
    %103 = vector.broadcast %cst_55 : f32 to vector<2x128xf32>
    %c0_56 = arith.constant 0 : index
    %c0_57 = arith.constant 0 : index
    %104 = vector.load %arg11[%c0_56, %c0_57] : memref<128x512xbf16, #tpu.memory_space<vmem>>, vector<128x512xbf16>
    %cst_58 = arith.constant dense<0.000000e+00> : vector<2x512xf32>
    %105 = tpu.matmul %102, %104, %cst_58 {dimension_numbers = #tpu.dot_dimension_numbers<[1], [0], [0], [1], [0, 0, 1, 1], [], []>} : vector<2x128xbf16>, vector<128x512xbf16>, vector<2x512xf32> -> vector<2x512xf32>
    %c0_59 = arith.constant 0 : index
    %c0_60 = arith.constant 0 : index
    %106 = vector.load %arg12[%c0_59, %c0_60] : memref<1x512xf32, #tpu.memory_space<vmem>>, vector<1x512xf32>
    %107 = vector.broadcast %106 : vector<1x512xf32> to vector<2x512xf32>
    %108 = arith.addf %105, %107 : vector<2x512xf32>
    %cst_61 = arith.constant 1.702000e+00 : f32
    %109 = vector.broadcast %cst_61 : f32 to vector<2x512xf32>
    %110 = arith.mulf %109, %108 : vector<2x512xf32>
    %111 = arith.negf %110 : vector<2x512xf32>
    %112 = math.exp %111 : vector<2x512xf32>
    %cst_62 = arith.constant 1.000000e+00 : f32
    %113 = vector.broadcast %cst_62 : f32 to vector<2x512xf32>
    %114 = arith.addf %113, %112 : vector<2x512xf32>
    %115 = arith.divf %113, %114 : vector<2x512xf32>
    %116 = arith.mulf %108, %115 : vector<2x512xf32>
    %117 = arith.truncf %116 : vector<2x512xf32> to vector<2x512xbf16>
    %c0_63 = arith.constant 0 : index
    %c0_64 = arith.constant 0 : index
    %118 = vector.load %arg13[%c0_63, %c0_64] : memref<512x128xbf16, #tpu.memory_space<vmem>>, vector<512x128xbf16>
    %cst_65 = arith.constant dense<0.000000e+00> : vector<2x128xf32>
    %119 = tpu.matmul %117, %118, %cst_65 {dimension_numbers = #tpu.dot_dimension_numbers<[1], [0], [0], [1], [0, 0, 1, 1], [], []>} : vector<2x512xbf16>, vector<512x128xbf16>, vector<2x128xf32> -> vector<2x128xf32>
    %120 = arith.addf %103, %119 : vector<2x128xf32>
    %121 = arith.addf %77, %120 : vector<2x128xf32>
    %c0_66 = arith.constant 0 : index
    %c0_67 = arith.constant 0 : index
    %122 = vector.load %arg14[%c0_66, %c0_67] : memref<1x128xf32, #tpu.memory_space<vmem>>, vector<1x128xf32>
    %123 = vector.broadcast %122 : vector<1x128xf32> to vector<2x128xf32>
    %124 = arith.addf %121, %123 : vector<2x128xf32>
    %c0_68 = arith.constant 0 : index
    %c0_69 = arith.constant 0 : index
    %c0_70 = arith.constant 0 : index
    %125 = vector.load %arg15[%c0_68, %c0_69, %c0_70] : memref<1x2x128xf32, #tpu.memory_space<vmem>>, vector<1x2x128xf32>
    %126 = vector.shape_cast %125 : vector<1x2x128xf32> to vector<2x128xf32>
    %127 = vector.shape_cast %124 : vector<2x128xf32> to vector<1x2x128xf32>
    tpu.vector_store %arg15[%c0_68, %c0_69, %c0_70], %127 {strides = array<i32>} : memref<1x2x128xf32, #tpu.memory_space<vmem>>, vector<1x2x128xf32>,
    return
  }
  func.func @transform_0(%arg0: i32) -> (i32, i32, i32) {
    %c0_i32 = arith.constant 0 : i32
    %c0_i32_0 = arith.constant 0 : i32
    %c0_i32_1 = arith.constant 0 : i32
    return %arg0, %c0_i32, %c0_i32_0 : i32, i32, i32
  }
  func.func @transform_1(%arg0: i32) -> (i32, i32, i32) {
    %c0_i32 = arith.constant 0 : i32
    %c0_i32_0 = arith.constant 0 : i32
    %c0_i32_1 = arith.constant 0 : i32
    return %arg0, %c0_i32, %c0_i32_0 : i32, i32, i32
  }
  func.func @transform_2(%arg0: i32) -> (i32, i32) {
    %c0_i32 = arith.constant 0 : i32
    %c0_i32_0 = arith.constant 0 : i32
    %c0_i32_1 = arith.constant 0 : i32
    return %c0_i32, %c0_i32_0 : i32, i32
  }
  func.func @transform_3(%arg0: i32) -> (i32, i32) {
    %c0_i32 = arith.constant 0 : i32
    %c0_i32_0 = arith.constant 0 : i32
    %c0_i32_1 = arith.constant 0 : i32
    return %c0_i32, %c0_i32_0 : i32, i32
  }
  func.func @transform_4(%arg0: i32) -> (i32, i32) {
    %c0_i32 = arith.constant 0 : i32
    %c0_i32_0 = arith.constant 0 : i32
    %c0_i32_1 = arith.constant 0 : i32
    return %c0_i32, %c0_i32_0 : i32, i32
  }
  func.func @transform_5(%arg0: i32) -> (i32, i32) {
    %c0_i32 = arith.constant 0 : i32
    %c0_i32_0 = arith.constant 0 : i32
    %c0_i32_1 = arith.constant 0 : i32
    return %c0_i32, %c0_i32_0 : i32, i32
  }
  func.func @transform_6(%arg0: i32) -> (i32, i32) {
    %c0_i32 = arith.constant 0 : i32
    %c0_i32_0 = arith.constant 0 : i32
    %c0_i32_1 = arith.constant 0 : i32
    return %c0_i32, %c0_i32_0 : i32, i32
  }
  func.func @transform_7(%arg0: i32) -> (i32, i32) {
    %c0_i32 = arith.constant 0 : i32
    %c0_i32_0 = arith.constant 0 : i32
    %c0_i32_1 = arith.constant 0 : i32
    return %c0_i32, %c0_i32_0 : i32, i32
  }
  func.func @transform_8(%arg0: i32) -> (i32, i32) {
    %c0_i32 = arith.constant 0 : i32
    %c0_i32_0 = arith.constant 0 : i32
    %c0_i32_1 = arith.constant 0 : i32
    return %c0_i32, %c0_i32_0 : i32, i32
  }
  func.func @transform_9(%arg0: i32) -> (i32, i32) {
    %c0_i32 = arith.constant 0 : i32
    %c0_i32_0 = arith.constant 0 : i32
    %c0_i32_1 = arith.constant 0 : i32
    return %c0_i32, %c0_i32_0 : i32, i32
  }
  func.func @transform_10(%arg0: i32) -> (i32, i32) {
    %c0_i32 = arith.constant 0 : i32
    %c0_i32_0 = arith.constant 0 : i32
    %c0_i32_1 = arith.constant 0 : i32
    return %c0_i32, %c0_i32_0 : i32, i32
  }
  func.func @transform_11(%arg0: i32) -> (i32, i32) {
    %c0_i32 = arith.constant 0 : i32
    %c0_i32_0 = arith.constant 0 : i32
    %c0_i32_1 = arith.constant 0 : i32
    return %c0_i32, %c0_i32_0 : i32, i32
  }
  func.func @transform_12(%arg0: i32) -> (i32, i32) {
    %c0_i32 = arith.constant 0 : i32
    %c0_i32_0 = arith.constant 0 : i32
    %c0_i32_1 = arith.constant 0 : i32
    return %c0_i32, %c0_i32_0 : i32, i32
  }
  func.func @transform_13(%arg0: i32) -> (i32, i32) {
    %c0_i32 = arith.constant 0 : i32
    %c0_i32_0 = arith.constant 0 : i32
    %c0_i32_1 = arith.constant 0 : i32
    return %c0_i32, %c0_i32_0 : i32, i32
  }
  func.func @transform_14(%arg0: i32) -> (i32, i32, i32) {
    %c0_i32 = arith.constant 0 : i32
    %c0_i32_0 = arith.constant 0 : i32
    %c0_i32_1 = arith.constant 0 : i32
    return %arg0, %c0_i32, %c0_i32_0 : i32, i32, i32
  }
}

</mosaic_0001>

<bundles_post_ra>
// kernel: sat_forward.3
= control target key start
LH: loop header
LB: loop body
LE: loop exit
PB: predicated region body
PF: predicated region fallthrough
CT: control target
= control target key end

     0   :  { %vm19_vm0 = vcmask 1041408   ;;  %vm38_vm1 = vcmask 1043456   ;;  %s159_s0 = inlined_call_operand.vmem [shape: f32[4,2,128], index: 0, kind: input, shape index: {}]   ;;  %s160_s1 = inlined_call_operand.vmem [shape: f32[2,4,128], index: 1, kind: input, shape index: {}]   ;;  %s161_s2 = inlined_call_operand.vmem [shape: f32[1,1,128], index: 2, kind: input, shape index: {}]   ;;  %s162_s3 = inlined_call_operand.hbm [shape: f32[2,128], index: 3, kind: output, shape index: {}]  }
   0x1   :  { %v15_v0 = vld [vmem:[%s159_s0] sm:$0x3]  ;;  %v16_v2 = vld [vmem:[%s159_s0 + $0x2] sm:$0x3]  ;;  %v28_v3 = vld [vmem:[%s160_s1 + $0x4] sm:$0xf] }
   0x2   :  { %v27_v1 = vld [vmem:[%s160_s1] sm:$0xf] }
   0x3   :  { %v75_v4 = vld [vmem:[%s161_s2] ss:$0 sm:$0xff] }
   0x4   :  { %8 = vsyncpa [#allocation3], 0  ;;  %v36_v5 = vmul.f32 %v75_v4, %v27_v1  ;;  %v37_v6 = vmul.f32 %v75_v4, %v28_v3  ;;  %v20_v7 = vsel %vm19_vm0, %v15_v0, 0.0  ;;  %v21_v8 = vsel %vm19_vm0, %v16_v2, 0.0  ;;  %v17_v9 = vld [vmem:[%s159_s0 + $0x4] sm:$0x3] }
   0x5   :  { %v22_v14 = vadd.f32 %v21_v8, %v20_v7  ;;  %v23_v15 = vsel %vm19_vm0, %v17_v9, 0.0  ;;  %v18_v18 = vld [vmem:[%s159_s0 + $0x6] sm:$0x3]  ;;  %vm55_vm2 = vcmask 1041409   ;;  %s101_s24 = smov [#allocation2]  }
   0x6   :  { %v39_v10 = vsel %vm38_vm1, %v36_v5, 0.0  ;;  %v46_v11 = vsel %vm38_vm1, %v37_v6, 0.0  ;;  %v25_v22 = vsel %vm19_vm0, %v18_v18, 0.0  ;;  %s67_s25 = sshll.u32 %s101_s24, 4  ;;  %s68_s25 = int_to_ptr.vmem [resolvable:$true] %s67_s25 }
   0x7   :  { %v40_v12 = vrot.slane %v39_v10, 4  ;;  %v47_v13 = vrot.slane %v46_v11, 4  ;;  %v24_v21 = vadd.f32 %v23_v15, %v22_v14  ;;  %s77_s0 = scalar_lea.vmem %s68_s25, 32  ;;  %p82_p1 = scmp.lt.s32.totalorder %s68_s25, %s68_s25 }
   0x8   :  { %p78_p0 = scmp.ne.s32.totalorder %s68_s25, %s77_s0  ;;  %p83_p2 = scmp.lt.s32.totalorder %s77_s0, %s77_s0 }
   0x9   :  { %v41_v16 = vadd.f32 %v40_v12, %v39_v10  ;;  %v48_v17 = vadd.f32 %v47_v13, %v46_v11  ;;  %v26_v27 = vadd.f32 %v25_v22, %v24_v21 }
   0xa   :  { %p84_p3 = por %p83_p2, %p82_p1 }
   0xb   :  { %v42_v19 = vrot.slane %v41_v16, 2  ;;  %v49_v20 = vrot.slane %v48_v17, 2 }
   0xc   :  { %p85_p4 = pnand %p84_p3, %p78_p0 }
   0xd   :  { %v43_v23 = vadd.f32 %v42_v19, %v41_v16  ;;  %v50_v24 = vadd.f32 %v49_v20, %v48_v17 }
   0xf   :  { %v44_v25 = vrot.slane %v43_v23, 1  ;;  %v51_v26 = vrot.slane %v50_v24, 1 }
  0x11   :  { %v45_v28 = vadd.f32 %v44_v25, %v43_v23  ;;  %v52_v29 = vadd.f32 %v51_v26, %v50_v24 }
  0x13   :  { %v56_v30 = vsel %vm55_vm2, %v52_v29, %v45_v28 }
  0x14   :  { %v58_v31 = vadd.f32 %v56_v30, %v26_v27 }
  0x16   :  { %v59_v32 = vmul.f32 0.125, %v58_v31 }
  0x18   :  { %60 = vst [vmem:[#allocation2] sm:$0x3] %v59_v32 }
  0x19   :  { %88 = shalt.err (!%p85_p4)
}
  0x1a   :  { %s89_s28 = scalar_lea.hbm %s162_s3, 32 }
  0x1b   :  { %p90_p5 = scmp.ne.s32.totalorder %s162_s3, %s89_s28  ;;  %p93_p6 = scmp.lt.u32.totalorder %s89_s28, %s162_s3 }
  0x1d   :  { %p95_p7 = pnand %p93_p6, %p90_p5 }
  0x1f   :  { %98 = shalt.err (!%p95_p7)
}
  0x20   :  { %70 = dma.vmem_to_hbm [thread:$0]  %s68_s25, 32, %s162_s3, [#allocation3]  }
  0x21   :  { %99 = dma.done.wait [#allocation3], 32  }
  0x22   :  { %100 = vsyncadd [#allocation3], 4294967264 }
  0x23   :  { %74 = vsyncpa [#allocation3], 1 }

// kernel: sat_forward.2
= control target key start
LH: loop header
LB: loop body
LE: loop exit
PB: predicated region body
PF: predicated region fallthrough
CT: control target
= control target key end

     0   :  { %s3060_s0 = inlined_call_operand.vmem [shape: f32[4,2,128], index: 0, kind: input, shape index: {}]   ;;  %s3061_s1 = inlined_call_operand.vmem [shape: f32[4,1,128], index: 1, kind: input, shape index: {}]   ;;  %s3062_s2 = inlined_call_operand.vmem [shape: f32[1,128], index: 2, kind: input, shape index: {}]   ;;  %s3063_s3 = inlined_call_operand.vmem [shape: f32[1,128], index: 3, kind: input, shape index: {}]   ;;  %s3064_s4 = inlined_call_operand.hbm [shape: bf16[128,384], index: 4, kind: input, shape index: {}]   ;;  %s3065_s5 = inlined_call_operand.vmem [shape: f32[1,384], index: 5, kind: input, shape index: {}]   ;;  %s3066_s6 = inlined_call_operand.vmem [shape: bf16[128,128], index: 6, kind: input, shape index: {}]   ;;  %s3067_s7 = inlined_call_operand.vmem [shape: f32[1,128], index: 7, kind: input, shape index: {}]   ;;  %s3068_s8 = inlined_call_operand.vmem [shape: f32[1,128], index: 8, kind: input, shape index: {}]   ;;  %s3069_s9 = inlined_call_operand.vmem [shape: f32[1,128], index: 9, kind: input, shape index: {}]   ;;  %s3070_s10 = inlined_call_operand.hbm [shape: bf16[128,512], index: 10, kind: input, shape index: {}]   ;;  %s3071_s11 = inlined_call_operand.vmem [shape: f32[1,512], index: 11, kind: input, shape index: {}]   ;;  %s3072_s12 = inlined_call_operand.hbm [shape: bf16[512,128], index: 12, kind: input, shape index: {}]   ;;  %s3073_s13 = inlined_call_operand.vmem [shape: f32[1,128], index: 13, kind: input, shape index: {}]   ;;  %s3074_s14 = inlined_call_operand.vmem [shape: f32[4,2,128], index: 14, kind: output, shape index: {}]  }
   0x1   :  { %3078 = sst [smem:[#allocation12_spill]] %s3073_s13 }
   0x2   :  { %3079 = sst [smem:[#allocation13_spill]] %s3074_s14 }
   0x3   :  { %19 = vsyncpa [#allocation5], 0 }
   0x4   :  { %20 = vsyncpa [#allocation7], 0  ;;  %s2795_s29 = smov 0  }
   0x5 LB: > { %3080 = sst [smem:[#allocation11_spill]] %s2703_s29  ;;  %s2705_s30 = smov [#allocation6]   ;;  %s2703_s29 = sphi %s2795_s29, %s26_s29  }
   0x6   : > { %s407_s15 = sshll.u32 %s2705_s30, 4  ;;  %s2801_s16 = sadd.s32 4294967295, %s2703_s29   ;;  %s2806_s15 = int_to_ptr.vmem [resolvable:$true] %s407_s15 }
   0x7   : > { %p2145_p0 = scmp.ge.s32.totalorder %s2703_s29, 1  ;;  %p361_p1 = scmp.lt.s32.totalorder %s2703_s29, 5 }
   0x8   : > { %p3076_p2 = scmp.eq.s32.totalorder %s2801_s16, 0  ;;  %s2706_s18 = smov [#allocation4]  }
   0x9   : > { %p2808_p3 = pnand %p2145_p0, %p361_p1  ;;  %s379_s19 = sshll.u32 %s2706_s18, 4  ;;  %s2814_s19 = int_to_ptr.vmem [resolvable:$true] %s379_s19 }
   0xa   : > { %s2707_s21 = smov [#allocation8]   ;;  %s2605_s25 = scalar_lea.hbm %s3070_s10, 4096 }
   0xb   : > { %s3081_s17 = scalar_select %p2808_p3, 1, 0 }
   0xc   : > { %p2418_p4 = pneg %p2808_p3  ;;  %s2822_s22 = sshll.u32 %s2707_s21, 4  ;;  %s424_s22 = int_to_ptr.vmem [resolvable:$true] %s2822_s22 }
   0xd   : > { %p2606_p6 = scmp.ne.s32.totalorder %s3070_s10, %s2605_s25  ;;  %p2612_p10 = scmp.lt.u32.totalorder %s2605_s25, %s3070_s10 }
   0xe   : > { %p2818_p5 = pnand %p3076_p2, %p2418_p4 }
  0x10   : > { %p2832_p7 = pneg %p2818_p5 }
  0x12   : > { %p2608_p8 = pnand %p2832_p7, %p2606_p6 }
  0x14   : > { %p2609_p9 = pneg %p2608_p8 }
  0x16   : > { %p2614_p11 = pnand %p2612_p10, %p2609_p9 }
  0x18   : > { %2617 = shalt.err (!%p2614_p11)
}
  0x19   : > { %s2618_s21 = scalar_lea.vmem %s2806_s15, 4096  ;;  %p2626_p1 = scmp.lt.s32.totalorder %s2806_s15, %s2806_s15 }
  0x1a   : > { %p2619_p12 = scmp.ne.s32.totalorder %s2806_s15, %s2618_s21  ;;  %p2627_p4 = scmp.lt.s32.totalorder %s2618_s21, %s2618_s21 }
  0x1c   : > { %p2621_p13 = pnand %p2619_p12, %p2832_p7  ;;  %p2628_p6 = por %p2627_p4, %p2626_p1 }
  0x1e   : > { %p2622_p0 = pneg %p2621_p13 }
  0x20   : > { %p2629_p8 = pnand %p2628_p6, %p2622_p0 }
  0x22   : > { %2632 = shalt.err (!%p2629_p8)
}
  0x23   : > { %s2708_s23 = smov 256   ;;  %s2709_s24 = smov 16  }
  0x24   : > { %2424 = dma.hbm_to_vmem [thread:$0]  (!%p2818_p5), %s3070_s10, 4096, %s2806_s15, [#allocation7], %s2708_s23, %s2708_s23, %s2709_s24  }
  0x25   : > { %s2633_s18 = scalar_lea.hbm %s3064_s4, 3072 }
  0x26   : > { %p2634_p9 = scmp.ne.s32.totalorder %s3064_s4, %s2633_s18  ;;  %p2640_p12 = scmp.lt.u32.totalorder %s2633_s18, %s3064_s4 }
  0x28   : > { %p2636_p10 = pnand %p2634_p9, %p2832_p7 }
  0x2a   : > { %p2637_p11 = pneg %p2636_p10 }
  0x2c   : > { %p2642_p13 = pnand %p2640_p12, %p2637_p11 }
  0x2e   : > { %2645 = shalt.err (!%p2642_p13)
}
  0x2f   : > { %s2646_s15 = scalar_lea.vmem %s2814_s19, 3072  ;;  %p2654_p6 = scmp.lt.s32.totalorder %s2814_s19, %s2814_s19 }
  0x30   : > { %p2647_p0 = scmp.ne.s32.totalorder %s2814_s19, %s2646_s15  ;;  %p2655_p8 = scmp.lt.s32.totalorder %s2646_s15, %s2646_s15 }
  0x32   : > { %p2649_p1 = pnand %p2647_p0, %p2832_p7  ;;  %p2656_p9 = por %p2655_p8, %p2654_p6 }
  0x34   : > { %p2650_p4 = pneg %p2649_p1 }
  0x36   : > { %p2657_p10 = pnand %p2656_p9, %p2650_p4 }
  0x38   : > { %2660 = shalt.err (!%p2657_p10)
}
  0x39   : > { %s2710_s14 = smov 192   ;;  %s2711_s13 = smov 12  }
  0x3a   : > { %2421 = dma.hbm_to_vmem [thread:$0]  (!%p2818_p5), %s3064_s4, 3072, %s2814_s19, [#allocation5], %s2710_s14, %s2710_s14, %s2711_s13  }
  0x3b   : > { %s2661_s26 = scalar_lea.hbm %s3072_s12, 4096 }
  0x3c   : > { %p2662_p11 = scmp.ne.s32.totalorder %s3072_s12, %s2661_s26  ;;  %p2668_p0 = scmp.lt.u32.totalorder %s2661_s26, %s3072_s12 }
  0x3e   : > { %p2664_p12 = pnand %p2662_p11, %p2832_p7 }
  0x40   : > { %p2665_p13 = pneg %p2664_p12 }
  0x42   : > { %p2670_p1 = pnand %p2668_p0, %p2665_p13 }
  0x44   : > { %2673 = shalt.err (!%p2670_p1)
}
  0x45   : > { %s2674_s15 = scalar_lea.vmem %s424_s22, 4096  ;;  %p2682_p9 = scmp.lt.s32.totalorder %s424_s22, %s424_s22 }
  0x46   : > { %p2675_p4 = scmp.ne.s32.totalorder %s424_s22, %s2674_s15  ;;  %p2683_p10 = scmp.lt.s32.totalorder %s2674_s15, %s2674_s15 }
  0x48   : > { %p2677_p6 = pnand %p2675_p4, %p2832_p7  ;;  %p2684_p2 = por %p2683_p10, %p2682_p9 }
  0x4a   : > { %p2678_p8 = pneg %p2677_p6 }
  0x4c   : > { %p2685_p3 = pnand %p2684_p2, %p2678_p8 }
  0x4e   : > { %2688 = shalt.err (!%p2685_p3)
}
  0x4f   : > { %s2712_s19 = smov 64   ;;  %s2713_s14 = smov 4  }
  0x50   : > { %2427 = dma.hbm_to_vmem [thread:$0]  (!%p2818_p5), %s3072_s12, 4096, %s424_s22, [#allocation7], %s2712_s19, %s2712_s19, %s2713_s14  }
  0x51   : > { %p3084_p11 = scmp.ne.s32.totalorder %s3081_s17, 0 }
  0x52   : > { %p3085_p12 = scmp.eq.s32.totalorder (!%p3084_p11), %s2801_s16, 0 }
  0x53   : > { %455 = sbr.rel (%p3084_p11) target bundleno = 3051 (0xbeb), region = 76 }
  0x5a   : > { %2694 = dma.done.wait (%p3085_p12), [#allocation5], 3072   ;;  %p3086_p7 = pmov %p3085_p12 }
  0x5c   : > { %2696 = vsyncadd (%p3086_p7), [#allocation5], 4294964224  ;;  %p3087_p2 = pmov %p3086_p7 }
  0x5e   : > { %2698 = dma.done.wait (%p3087_p2), [#allocation7], 8192   ;;  %p3088_p3 = pmov %p3087_p2 }
  0x5f   : > { %p510_p13 = scmp.lt.s32.totalorder %s2801_s16, 3  ;;  %vm531_vm0 = vcmask 1041408   ;;  %v2457_v4 = vld [vmem:[#allocation4 + $0x4] ss:$12 sps:$4 sm:$0xff]   ;;  %v2459_v5 = vld [vmem:[#allocation4] ss:$12 sps:$4 sm:$0xff]   ;;  %v597_v45 = vlaneseq }
  0x60   : > { %2700 = vsyncadd (%p3088_p3), [#allocation7], 4294959104  ;;  %v2714_v6 = vmov 0.0   ;;  %v2460_v7 = vld [vmem:[#allocation4 + $0x8] ss:$12 sps:$4 sm:$0xff]   ;;  %740 = vmatprep.subr.bf16.mxu0 %v2457_v4  ;;  %v2715_v29 = vmov 0  }
  0x61   : > { %s3093_s16 = smov (!%p510_p13, %s2801_s16), 3  ;;  %2346 = vmatprep.subr.bf16.mxu1 %v2714_v6  ;;  %v2461_v8 = vld [vmem:[#allocation4 + $0x1c] ss:$12 sps:$4 sm:$0xff]   ;;  %v2463_v9 = vld [vmem:[#allocation4 + $0x18] ss:$12 sps:$4 sm:$0xff]   ;;  %741 = vmatpush1.bf16.msra.mxu0 %v2459_v5  ;;  %vm2716_vm1 = vmmov 0  }
  0x62   : > { %s2154_s17 = sshll.u32 %s3093_s16, 1  ;;  %s516_s28 = scalar_lea.vmem %s3061_s1, %s3093_s16  ;;  %v2464_v10 = vld [vmem:[#allocation4 + $0x20] ss:$12 sps:$4 sm:$0xff]   ;;  %2347 = vmatpush3.bf16.msra.mxu1 %v2460_v7  ;;  %742 = vmatprep.subr.bf16.mxu0 %v2461_v8  ;;  %v2467_v17 = vld [vmem:[#allocation4 + $0x30] ss:$12 sps:$4 sm:$0xff]   ;;  %v2948_v46 = vshrl.u32 %v597_v45, 7 }
  0x63   : > { %s513_s25 = scalar_lea.vmem %s3060_s0, %s2154_s17  ;;  %v2156_v1 = vld [vmem:[%s516_s28] ss:$0 sm:$0xff]  ;;  %v2465_v11 = vld [vmem:[#allocation4 + $0x34] ss:$12 sps:$4 sm:$0xff]   ;;  %2348 = vmatprep.subr.bf16.mxu1 %v2714_v6  ;;  %v2468_v18 = vld [vmem:[#allocation4 + $0x38] ss:$12 sps:$4 sm:$0xff]   ;;  %772 = vmatprep.mubr.bf16.mxu0 %v2715_v29 }
  0x64   : > { %v522_v0 = vld [vmem:[%s513_s25] sm:$0x3]  ;;  %v2469_v19 = vld [vmem:[#allocation4 + $0x4c] ss:$12 sps:$4 sm:$0xff]   ;;  %v2472_v21 = vld [vmem:[#allocation4 + $0x50] ss:$12 sps:$4 sm:$0xff]   ;;  %2362 = vmatprep.mubr.msk.bf16.mxu1 %vm2716_vm1, %v2714_v6 }
  0x65   : > { %v2919_v2 = vadd.f32 %v2156_v1, %v522_v0  ;;  %743 = vmatpush1.bf16.msra.mxu0 %v2463_v9  ;;  %v2471_v20 = vld [vmem:[#allocation4 + $0x48] ss:$12 sps:$4 sm:$0xff]   ;;  %v2473_v22 = vld [vmem:[#allocation4 + $0x64] ss:$12 sps:$4 sm:$0xff]   ;;  %v2475_v23 = vld [vmem:[#allocation4 + $0x60] ss:$12 sps:$4 sm:$0xff]  }
  0x66   : > { %2349 = vmatpush3.bf16.msra.mxu1 %v2464_v10  ;;  %744 = vmatprep.subr.bf16.mxu0 %v2465_v11  ;;  %v2476_v24 = vld [vmem:[#allocation4 + $0x68] ss:$12 sps:$4 sm:$0xff]   ;;  %v2479_v26 = vld [vmem:[#allocation4 + $0x78] ss:$12 sps:$4 sm:$0xff]   ;;  %v2480_v27 = vld [vmem:[#allocation4 + $0x80] ss:$12 sps:$4 sm:$0xff]  }
  0x67   : > { %v532_v3 = vsel %vm531_vm0, %v2919_v2, 0.0  ;;  %2350 = vmatprep.subr.bf16.mxu1 %v2714_v6  ;;  %v2477_v25 = vld [vmem:[#allocation4 + $0x7c] ss:$12 sps:$4 sm:$0xff]   ;;  %v2481_v28 = vld [vmem:[#allocation4 + $0x94] ss:$12 sps:$4 sm:$0xff]   ;;  %v599_v47 = vsub.s32 0, %v2948_v46 }
  0x68   : > { %533 = vadd.xlane.f32.xlu0 %v532_v3  ;;  %v2483_v30 = vld [vmem:[#allocation4 + $0x90] ss:$12 sps:$4 sm:$0xff]   ;;  %v2484_v31 = vld [vmem:[#allocation4 + $0x98] ss:$12 sps:$4 sm:$0xff]   ;;  %v2487_v33 = vld [vmem:[#allocation4 + $0xa8] ss:$12 sps:$4 sm:$0xff]  }
  0x69   : > { %745 = vmatpush1.bf16.msra.mxu0 %v2467_v17  ;;  %v2485_v32 = vld [vmem:[#allocation4 + $0xac] ss:$12 sps:$4 sm:$0xff]   ;;  %v2488_v34 = vld [vmem:[#allocation4 + $0xb0] ss:$12 sps:$4 sm:$0xff]   ;;  %v2157_v39 = vld [vmem:[%s3062_s2] ss:$0 sm:$0xff] }
  0x6a   : > { %2351 = vmatpush3.bf16.msra.mxu1 %v2468_v18  ;;  %746 = vmatprep.subr.bf16.mxu0 %v2469_v19  ;;  %v2158_v41 = vld [vmem:[%s3063_s3] ss:$0 sm:$0xff]  ;;  %v607_v49 = vsub.s32 2, %v2948_v46  ;;  %v2717_v50 = vmov 1983009808   ;;  %v603_v52 = vsub.s32 1, %v2948_v46 }
  0x6b   : > { %2352 = vmatprep.subr.bf16.mxu1 %v2714_v6  ;;  %v595_v48 = vld [vmem:[%s3065_s5] sm:$0x7]  ;;  %v826_v51 = vunpack.c.l.s4 %v2717_v50  ;;  %vm845_vm2 = vcmask 523264   ;;  %s2718_s19 = smov 64   ;;  %vm922_vm3 = vcmask 9216   ;;  %vm934_vm4 = vcmask 15360  }
  0x6c   : > { %v600_v53 = vrot.slane %v595_v48, %v599_v47  ;;  %v608_v54 = vrot.slane %v595_v48, %v607_v49  ;;  %v604_v56 = vrot.slane %v595_v48, %v603_v52  ;;  %vm1012_vm5 = vcmask 516096   ;;  %v2489_v48 = vld [vmem:[%s3066_s6] sm:$0xff]   ;;  %v2490_v50 = vld [vmem:[%s3066_s6 + $0x8] sm:$0xff]   ;;  %s3089_s27 = sld [smem:[#allocation12_spill]]  ;;  %s3090_s21 = sld [smem:[#allocation13_spill]] }
  0x6d   : > { %747 = vmatpush1.bf16.msra.mxu0 %v2471_v20  ;;  %v827_v55 = vunpack.c.0.s8 %v826_v51  ;;  %v2491_v51 = vld [vmem:[%s3066_s6 + $0x10] sm:$0xff]   ;;  %vm1226_vm6 = vcmask 1040896  }
  0x6e   : > { %2353 = vmatpush3.bf16.msra.mxu1 %v2472_v21  ;;  %748 = vmatprep.subr.bf16.mxu0 %v2473_v22 }
  0x6f   : > { %2354 = vmatprep.subr.bf16.mxu1 %v2714_v6  ;;  %v830_v63 = vsub.s32 %v827_v55, %v2948_v46  ;;  %v2494_v55 = vld [vmem:[%s3066_s6 + $0x28] sm:$0xff]  }
  0x71   : > { %749 = vmatpush1.bf16.msra.mxu0 %v2475_v23 }
  0x72   : > { %2355 = vmatpush3.bf16.msra.mxu1 %v2476_v24  ;;  %750 = vmatprep.subr.bf16.mxu0 %v2477_v25  ;;  %s520_s15 = scalar_lea.vmem %s3090_s21, %s2154_s17 }
  0x73   : > { %2356 = vmatprep.subr.bf16.mxu1 %v2714_v6 }
  0x75   : > { %751 = vmatpush1.bf16.msra.mxu0 %v2479_v26 }
  0x76   : > { %2357 = vmatpush3.bf16.msra.mxu1 %v2480_v27  ;;  %752 = vmatprep.subr.bf16.mxu0 %v2481_v28 }
  0x77   : > { %2358 = vmatprep.subr.bf16.mxu1 %v2714_v6 }
  0x79   : > { %753 = vmatpush1.bf16.msra.mxu0 %v2483_v30 }
  0x7a   : > { %2359 = vmatpush3.bf16.msra.mxu1 %v2484_v31  ;;  %754 = vmatprep.subr.bf16.mxu0 %v2485_v32 }
  0x7b   : > { %2360 = vmatprep.subr.bf16.mxu1 %v2714_v6 }
  0x7d   : > { %755 = vmatpush1.bf16.msra.mxu0 %v2487_v33 }
  0x7e   : > { %2361 = vmatpush3.bf16.msra.mxu1 %v2488_v34  ;;  %2386 = vmatprep.subr.bf16.mxu0 %v2714_v6 }
  0x7f   : > { %2366 = vmatprep.subr.mxu1 %v2714_v6 }
  0xf5   : > { %v534_v12 = vpop.xlane.xlu0 %533 }
  0xf6   : > { %v536_v13 = vmul.f32 0.0078125, %v534_v12 }
  0xf8   : > { %v537_v14 = vsub.f32 %v2919_v2, %v536_v13 }
  0xfa   : > { %v538_v15 = vmul.f32 %v537_v14, %v537_v14 }
  0xfc   : > { %v539_v16 = vsel %vm531_vm0, %v538_v15, 0.0 }
  0xfd   : > { %540 = vadd.xlane.f32.xlu0 %v539_v16 }
 0x18a   : > { %v541_v35 = vpop.xlane.xlu0 %540 }
 0x18b   : > { %v542_v36 = vmul.f32 0.0078125, %v541_v35 }
 0x18d   : > { %v543_v37 = vadd.f32 1e-05, %v542_v36 }
 0x18f   : > { %2577 = vrsqrt.f32 %v543_v37 }
 0x199   : > { %v2578_v38 = vpop.eup %2577 }
 0x19a   : > { %v545_v40 = vmul.f32 %v2578_v38, %v537_v14 }
 0x19c   : > { %v553_v42 = vmul.f32 %v2157_v39, %v545_v40 }
 0x19e   : > { %v561_v43 = vadd.f32 %v2158_v41, %v553_v42 }
 0x1a0   : > { %v562_v44 = vpack.c.bf16 %v561_v43, %v561_v43 }
 0x1a2   : > { %773 = vmatmul.mubr.bf16.vlgmr.msra.gmra.mrb[0].mxu0 %v562_v44  ;;  %2363 = vmatmul.mubr.bf16.vlgmr.msra.gmra.mrb[0].mxu1 %v562_v44 }
 0x1a3   : > { %2368 = vmatprep.mubr.msk.f32.mxu1 %vm2716_vm1, %v2714_v6  ;;  %2402 = vmatprep.mubr.msk.bf16.mxu0 %vm2716_vm1, %v2714_v6 }
 0x1a4   : > { %2387 = vmatpush3.bf16.msra.mxu0 %v2489_v48  ;;  %v2541_v48 = vld [vmem:[#allocation6 + $0xe4] ss:$16 sps:$4 sm:$0xff]  }
 0x1a5   : > { %2388 = vmatprep.subr.bf16.mxu0 %v2714_v6 }
 0x1a8   : > { %2389 = vmatpush3.bf16.msra.mxu0 %v2490_v50  ;;  %v2544_v50 = vld [vmem:[#allocation6 + $0xec] ss:$16 sps:$4 sm:$0xff]  }
 0x1a9   : > { %2390 = vmatprep.subr.bf16.mxu0 %v2714_v6 }
 0x1ac   : > { %2391 = vmatpush3.bf16.msra.mxu0 %v2491_v51  ;;  %v2539_v51 = vld [vmem:[#allocation6 + $0xe0] ss:$16 sps:$4 sm:$0xff]  }
 0x1ad   : > { %2392 = vmatprep.subr.bf16.mxu0 %v2714_v6 }
 0x275   : > { %v774_v57 = vpop.f32.mrb[0].mxu0  ;;  %v815_v58 = vpop.f32.mrb[0].mxu1 }
 0x276   : > { %v775_v59 = vadd.f32 %v774_v57, %v600_v53  ;;  %v776_v60 = vpop.f32.mrb[1].mxu0  ;;  %v2364_v61 = vpop.f32.mrb[1].mxu1  ;;  %v816_v62 = vadd.f32 %v815_v58, %v608_v54  ;;  %v2492_v53 = vld [vmem:[%s3066_s6 + $0x18] sm:$0xff]   ;;  %v2493_v54 = vld [vmem:[%s3066_s6 + $0x20] sm:$0xff]   ;;  %v2495_v58 = vld [vmem:[%s3066_s6 + $0x30] sm:$0xff]  }
 0x277   : > { %v777_v0 = vadd.f32 %v776_v60, %v604_v56  ;;  %v778_v1 = vpop.f32.mrb[2].mxu0  ;;  %v818_v3 = vpop.f32.mrb[2].mxu1  ;;  %2393 = vmatpush3.bf16.msra.mxu0 %v2492_v53  ;;  %v2719_v56 = vmov 1966171168   ;;  %v2496_v60 = vld [vmem:[%s3066_s6 + $0x38] sm:$0xff]  }
 0x278   : > { %v779_v4 = vpop.f32.mrb[3].mxu0  ;;  %v2365_v5 = vpop.f32.mrb[3].mxu1  ;;  %v838_v8 = vrot.slane %v816_v62, %v830_v63  ;;  %2394 = vmatprep.subr.bf16.mxu0 %v2714_v6  ;;  %v1210_v57 = vunpack.c.l.s4 %v2719_v56  ;;  %v2542_v53 = vld [vmem:[#allocation6 + $0xe8] ss:$16 sps:$4 sm:$0xff]  }
 0x279   : > { %v824_v7 = vcombine.low %v775_v59, %v777_v0 }
 0x27a   : > { %v1211_v59 = vunpack.c.0.s8 %v1210_v57 }
 0x27b   : > { %v831_v9 = vrot.slane %v824_v7, %v830_v63  ;;  %2395 = vmatpush3.bf16.msra.mxu0 %v2493_v54 }
 0x27c   : > { %2396 = vmatprep.subr.bf16.mxu0 %v2714_v6  ;;  %v1214_v61 = vsub.s32 %v1211_v59, %v2948_v46 }
 0x27d   : > { %v839_v10 = vcombine.low %v831_v9, %v838_v8 }
 0x27f   : > { %841 = vst [vmem:[#allocation2] sm:$0x3f] %v839_v10  ;;  %2397 = vmatpush3.bf16.msra.mxu0 %v2494_v55 }
 0x280   : > { %2398 = vmatprep.subr.bf16.mxu0 %v2714_v6 }
 0x283   : > { %2399 = vmatpush3.bf16.msra.mxu0 %v2495_v58  ;;  %v2203_v58 = vld [vmem:[%s3068_s8] ss:$0 sm:$0xff] }
 0x284   : > { %2400 = vmatprep.subr.bf16.mxu0 %v2714_v6 }
 0x286   : > { %v2188_v11 = vld.sshfl [vmem:[#allocation2 + $0x2] sm:$0x3 pattern:$0x76325410]  ;;  %v842_v13 = vld [vmem:[#allocation2] sm:$0x3] }
 0x287   : > { %v843_v12 = vld [vmem:[#allocation2 + $0x2] sm:$0x3]  ;;  %1035 = vrot.lane.b32.xlu0 %v2188_v11, %s2718_s19  ;;  %v844_v14 = vld [vmem:[#allocation2 + $0x4] sm:$0x3]  ;;  %2401 = vmatpush3.bf16.msra.mxu0 %v2496_v60  ;;  %v2204_v60 = vld [vmem:[%s3069_s9] ss:$0 sm:$0xff] }
 0x288   : > { %2367 = vmatpush3.xpose.msk.msra.mxu1 %vm845_vm2, %v843_v12  ;;  %v2187_v23 = vld.sshfl [vmem:[#allocation2] sm:$0x3 pattern:$0x76325410] }
 0x289   : > { %2371 = vmatprep.subr.mxu1 %v2714_v6  ;;  %v2191_v41 = vld.sshfl [vmem:[#allocation2 + $0x4] sm:$0x3 pattern:$0x76325410] }
 0x28b   : > { %2369 = vmatmul.mubr.msk.f32.vlgmr.msra.gmra.mrb[4].mxu1 %vm845_vm2, %v842_v13 }
 0x28c   : > { %2372 = vmatpush3.msk.msra.mxu1 %vm531_vm0, %v844_v14  ;;  %2373 = vmatprep.mubr.msk.f32.mxu1 %vm2716_vm1, %v2714_v6  ;;  %v2497_v14 = vld [vmem:[#allocation6] ss:$16 sps:$4 sm:$0xff]  }
 0x28d   : > { %2376 = vmatprep.subr.mxu1 %v2714_v6 }
 0x2f9   : > { %v1036_v27 = vpop.permute.xlu0 %1035 }
 0x35e   : > { %v918_v15 = vpop.f32.mrb[4].mxu1 }
 0x35f   : > { %v2370_v16 = vpop.f32.mrb[5].mxu1  ;;  %v923_v17 = vsel %vm922_vm3, %v918_v15, -inf }
 0x360   : > { %924 = vmax.xlane.f32.xlu1 %v923_v17  ;;  %v2500_v16 = vld [vmem:[#allocation6 + $0x8] ss:$16 sps:$4 sm:$0xff]   ;;  %v2505_v17 = vld [vmem:[#allocation6 + $0x24] ss:$16 sps:$4 sm:$0xff]  }
 0x3ed   : > { %v925_v18 = vpop.xlane.xlu1 %924 }
 0x3ee   : > { %v926_v19 = vsub.f32 %v918_v15, %v925_v18  ;;  %v2499_v15 = vld [vmem:[#allocation6 + $0x4] ss:$16 sps:$4 sm:$0xff]   ;;  %v2508_v18 = vld [vmem:[#allocation6 + $0x2c] ss:$16 sps:$4 sm:$0xff]  }
 0x3f0   : > { %v927_v20 = vmul.f32 1.442695, %v926_v19  ;;  %v2503_v19 = vld [vmem:[#allocation6 + $0x20] ss:$16 sps:$4 sm:$0xff]  }
 0x3f2   : > { %2579 = vpow2.f32 %v927_v20  ;;  %v2511_v20 = vld [vmem:[#allocation6 + $0x44] ss:$16 sps:$4 sm:$0xff]  }
 0x3fc   : > { %v2580_v21 = vpop.eup %2579 }
 0x3fd   : > { %v929_v22 = vsel %vm922_vm3, %v2580_v21, 0.0 }
 0x3fe   : > { %930 = vadd.xlane.f32.xlu1 %v929_v22  ;;  %v2509_v22 = vld [vmem:[#allocation6 + $0x40] ss:$16 sps:$4 sm:$0xff]  }
 0x40f   : > { %1025 = vrot.lane.b32.xlu1 %v2187_v23, %s2718_s19  ;;  %v2512_v23 = vld [vmem:[#allocation6 + $0x48] ss:$16 sps:$4 sm:$0xff]  }
 0x48b   : > { %v931_v24 = vpop.xlane.xlu1 %930 }
 0x48c   : > { %2581 = vrcp.f32 %v931_v24 }
 0x48f   : > { %v1026_v28 = vpop.permute.xlu1 %1025 }
 0x496   : > { %v2582_v25 = vpop.eup %2581 }
 0x497   : > { %v933_v26 = vmul.f32 %v2582_v25, %v2580_v21  ;;  %v2514_v21 = vld [vmem:[#allocation6 + $0x4c] ss:$16 sps:$4 sm:$0xff]  }
 0x499   : > { %2374 = vmatmul.mubr.msk.f32.vlgmr.msra.gmra.mrb[6].mxu1 %vm934_vm4, %v933_v26 }
 0x49a   : > { %2377 = vmatpush3.xpose.msk.msra.mxu1 %vm845_vm2, %v1036_v27  ;;  %2378 = vmatprep.mubr.msk.f32.mxu1 %vm2716_vm1, %v2714_v6 }
 0x49b   : > { %2381 = vmatprep.subr.mxu1 %v2714_v6 }
 0x49d   : > { %2379 = vmatmul.mubr.msk.f32.vlgmr.msra.gmra.mrb[8].mxu1 %vm845_vm2, %v1026_v28 }
 0x49e   : > { %2383 = vmatprep.mubr.msk.f32.mxu1 %vm2716_vm1, %v2714_v6  ;;  %v2202_v6 = vld [vmem:[%s3067_s7] ss:$0 sm:$0xff] }
 0x56c   : > { %v1007_v30 = vpop.f32.mrb[6].mxu1 }
 0x56d   : > { %v1011_v31 = vpack.c.bf16 %v1007_v30, %v1007_v30  ;;  %v2375_v32 = vpop.f32.mrb[7].mxu1  ;;  %v2517_v30 = vld [vmem:[#allocation6 + $0x64] ss:$16 sps:$4 sm:$0xff]  }
 0x56e   : > { %v2515_v32 = vld [vmem:[#allocation6 + $0x60] ss:$16 sps:$4 sm:$0xff]  }
 0x56f   : > { %1013 = vst.msk [vmem:[#allocation3] sm:$0x1] %vm1012_vm5, %v1011_v31  ;;  %v2520_v31 = vld [vmem:[#allocation6 + $0x6c] ss:$16 sps:$4 sm:$0xff]  }
 0x570   : > { %v1107_v33 = vpop.f32.mrb[8].mxu1 }
 0x571   : > { %v2380_v34 = vpop.f32.mrb[9].mxu1  ;;  %v1111_v35 = vsel %vm922_vm3, %v1107_v33, -inf }
 0x572   : > { %1112 = vmax.xlane.f32.xlu1 %v1111_v35  ;;  %v2523_v34 = vld [vmem:[#allocation6 + $0x84] ss:$16 sps:$4 sm:$0xff]   ;;  %v2526_v35 = vld [vmem:[#allocation6 + $0x8c] ss:$16 sps:$4 sm:$0xff]  }
 0x5ff   : > { %v1113_v36 = vpop.xlane.xlu1 %1112 }
 0x600   : > { %v1114_v37 = vsub.f32 %v1107_v33, %v1113_v36  ;;  %v2518_v33 = vld [vmem:[#allocation6 + $0x68] ss:$16 sps:$4 sm:$0xff]   ;;  %v2521_v36 = vld [vmem:[#allocation6 + $0x80] ss:$16 sps:$4 sm:$0xff]  }
 0x602   : > { %v1115_v38 = vmul.f32 1.442695, %v1114_v37  ;;  %v2524_v37 = vld [vmem:[#allocation6 + $0x88] ss:$16 sps:$4 sm:$0xff]  }
 0x604   : > { %2583 = vpow2.f32 %v1115_v38  ;;  %v2529_v38 = vld [vmem:[#allocation6 + $0xa4] ss:$16 sps:$4 sm:$0xff]  }
 0x60e   : > { %v2584_v39 = vpop.eup %2583 }
 0x60f   : > { %v1117_v40 = vsel %vm922_vm3, %v2584_v39, 0.0 }
 0x610   : > { %1118 = vadd.xlane.f32.xlu0 %v1117_v40  ;;  %v2527_v40 = vld [vmem:[#allocation6 + $0xa0] ss:$16 sps:$4 sm:$0xff]  }
 0x626   : > { %1130 = vrot.lane.b32.xlu0 %v2191_v41, %s2718_s19  ;;  %v2530_v41 = vld [vmem:[#allocation6 + $0xa8] ss:$16 sps:$4 sm:$0xff]  }
 0x69d   : > { %v1119_v42 = vpop.xlane.xlu0 %1118 }
 0x69e   : > { %2585 = vrcp.f32 %v1119_v42  ;;  %v2533_v42 = vld [vmem:[#allocation6 + $0xc0] ss:$16 sps:$4 sm:$0xff]  }
 0x6a1   : > { %v1131_v43 = vpop.permute.xlu0 %1130 }
 0x6a2   : > { %2382 = vmatpush3.msk.msra.mxu1 %vm531_vm0, %v1131_v43  ;;  %v2535_v43 = vld [vmem:[#allocation6 + $0xc4] ss:$16 sps:$4 sm:$0xff]  }
 0x6a3   : > { %1586 = vmatprep.subr.bf16.mxu1 %v2499_v15  ;;  %v2558_v15 = vld [vmem:[#allocation8 + $0xd8] sm:$0xff]  }
 0x6a8   : > { %v2586_v44 = vpop.eup %2585 }
 0x6a9   : > { %v1121_v45 = vmul.f32 %v2586_v44, %v2584_v39  ;;  %v2532_v39 = vld [vmem:[#allocation6 + $0xac] ss:$16 sps:$4 sm:$0xff]   ;;  %v2536_v44 = vld [vmem:[#allocation6 + $0xc8] ss:$16 sps:$4 sm:$0xff]  }
 0x6ab   : > { %2384 = vmatmul.mubr.msk.f32.vlgmr.msra.gmra.mrb[10].mxu1 %vm934_vm4, %v1121_v45  ;;  %v2538_v45 = vld [vmem:[#allocation6 + $0xcc] ss:$16 sps:$4 sm:$0xff]  }
 0x6ac   : > { %1618 = vmatprep.mubr.bf16.mxu1 %v2715_v29  ;;  %1587 = vmatpush1.bf16.msra.mxu1 %v2497_v14  ;;  %v2557_v14 = vld [vmem:[#allocation8 + $0x58] sm:$0xff]  }
 0x6ad   : > { %1588 = vmatprep.subr.bf16.mxu1 %v2505_v17  ;;  %v2561_v17 = vld [vmem:[#allocation8 + $0x60] sm:$0xff]  }
 0x6b0   : > { %1589 = vmatpush1.bf16.msra.mxu1 %v2503_v19  ;;  %v2563_v19 = vld [vmem:[#allocation8 + $0x20] sm:$0xff]  }
 0x6b1   : > { %1590 = vmatprep.subr.bf16.mxu1 %v2511_v20  ;;  %v2565_v20 = vld [vmem:[#allocation8 + $0x68] sm:$0xff]  }
 0x6b4   : > { %1591 = vmatpush1.bf16.msra.mxu1 %v2509_v22  ;;  %v2567_v22 = vld [vmem:[#allocation8 + $0x28] sm:$0xff]  }
 0x6b5   : > { %1592 = vmatprep.subr.bf16.mxu1 %v2517_v30  ;;  %v2574_v30 = vld [vmem:[#allocation8 + $0xf8] sm:$0xff]  }
 0x6b8   : > { %1593 = vmatpush1.bf16.msra.mxu1 %v2515_v32  ;;  %v2576_v32 = vld [vmem:[#allocation8 + $0xb8] sm:$0xff]  }
 0x6b9   : > { %1594 = vmatprep.subr.bf16.mxu1 %v2523_v34  ;;  %v1420_v34 = vsub.s32 3, %v2948_v46 }
 0x6bc   : > { %1595 = vmatpush1.bf16.msra.mxu1 %v2521_v36 }
 0x6bd   : > { %1596 = vmatprep.subr.bf16.mxu1 %v2529_v38 }
 0x6c0   : > { %1597 = vmatpush1.bf16.msra.mxu1 %v2527_v40 }
 0x6c1   : > { %1598 = vmatprep.subr.bf16.mxu1 %v2535_v43 }
 0x6c4   : > { %1599 = vmatpush1.bf16.msra.mxu1 %v2533_v42 }
 0x6c5   : > { %1600 = vmatprep.subr.bf16.mxu1 %v2541_v48 }
 0x6c8   : > { %1601 = vmatpush1.bf16.msra.mxu1 %v2539_v51 }
 0x77e   : > { %v1203_v62 = vpop.f32.mrb[10].mxu1 }
 0x77f   : > { %v1207_v63 = vpack.c.bf16 %v1203_v62, %v1203_v62  ;;  %v2385_v0 = vpop.f32.mrb[11].mxu1 }
 0x780   : > { %v2545_v0 = vld [vmem:[#allocation8 + $0x40] sm:$0xff]  }
 0x781   : > { %v1215_v1 = vrot.slane %v1207_v63, %v1214_v61  ;;  %2302 = vmatprep.subr.bf16.mxu1 %v2545_v0 }
 0x783   : > { %v1222_v3 = vrot.slane %v1215_v1, %v1214_v61  ;;  %v2546_v1 = vld [vmem:[#allocation8 + $0xc0] sm:$0xff]  }
 0x785   : > { %1223 = vrot.lane.b32.xlu1 %v1222_v3, %s2718_s19  ;;  %v2547_v3 = vld [vmem:[#allocation8] sm:$0xff]  }
 0x7f7   : > { %v1224_v4 = vpop.permute.xlu1 %1223 }
 0x7f8   : > { %1227 = vst.msk [vmem:[#allocation3] sm:$0x1] %vm1226_vm6, %v1224_v4  ;;  %v2548_v4 = vld [vmem:[#allocation8 + $0x80] sm:$0xff]  }
 0x7ff   : > { %v1228_v5 = vld [vmem:[#allocation3] sm:$0x1] }
 0x800   : > { %2403 = vmatmul.mubr.bf16.vlgmr.msra.gmra.mrb[4].mxu0 %v1228_v5  ;;  %v2549_v5 = vld [vmem:[#allocation8 + $0x48] sm:$0xff]  }
 0x801   : > { %1659 = vmatprep.mubr.bf16.mxu0 %v2715_v29  ;;  %v2502_v29 = vld [vmem:[#allocation6 + $0xc] ss:$16 sps:$4 sm:$0xff]  }
 0x802   : > { %1627 = vmatprep.subr.bf16.mxu0 %v2502_v29  ;;  %v2560_v29 = vld [vmem:[#allocation8 + $0x98] sm:$0xff]  }
 0x803   : > { %1628 = vmatpush1.bf16.msra.mxu0 %v2500_v16  ;;  %v2559_v16 = vld [vmem:[#allocation8 + $0x18] sm:$0xff]  }
 0x804   : > { %1629 = vmatprep.subr.bf16.mxu0 %v2508_v18  ;;  %v2562_v18 = vld [vmem:[#allocation8 + $0xe0] sm:$0xff]  }
 0x8d3   : > { %v1327_v7 = vpop.f32.mrb[4].mxu0 }
 0x8d4   : > { %v1333_v8 = vadd.f32 %v1327_v7, %v2919_v2  ;;  %v2404_v9 = vpop.f32.mrb[5].mxu0  ;;  %v2506_v2 = vld [vmem:[#allocation6 + $0x28] ss:$16 sps:$4 sm:$0xff]  }
 0x8d5   : > { %v1330_v10 = vpop.f32.mrb[6].mxu0  ;;  %1630 = vmatpush1.bf16.msra.mxu0 %v2506_v2  ;;  %v2550_v7 = vld [vmem:[#allocation8 + $0xc8] sm:$0xff]   ;;  %v2553_v9 = vld [vmem:[#allocation8 + $0x50] sm:$0xff]   ;;  %v2564_v2 = vld [vmem:[#allocation8 + $0xa0] sm:$0xff]  }
 0x8d6   : > { %v3026_v11 = vadd.f32 %v2202_v6, %v1333_v8  ;;  %v2405_v12 = vpop.f32.mrb[7].mxu0  ;;  %1631 = vmatprep.subr.bf16.mxu0 %v2514_v21  ;;  %v2551_v6 = vld [vmem:[#allocation8 + $0x8] sm:$0xff]   ;;  %v2554_v10 = vld [vmem:[#allocation8 + $0xd0] sm:$0xff]  }
 0x8d7   : > { %v2552_v8 = vld [vmem:[#allocation8 + $0x88] sm:$0xff]   ;;  %v2555_v12 = vld [vmem:[#allocation8 + $0x10] sm:$0xff]  }
 0x8d8   : > { %v1342_v13 = vsel %vm531_vm0, %v3026_v11, 0.0  ;;  %v2566_v21 = vld [vmem:[#allocation8 + $0xe8] sm:$0xff]  }
 0x8d9   : > { %1343 = vadd.xlane.f32.xlu1 %v1342_v13  ;;  %1632 = vmatpush1.bf16.msra.mxu0 %v2512_v23  ;;  %v2556_v13 = vld [vmem:[#allocation8 + $0x90] sm:$0xff]   ;;  %v2568_v23 = vld [vmem:[#allocation8 + $0xa8] sm:$0xff]  }
 0x8da   : > { %1633 = vmatprep.subr.bf16.mxu0 %v2520_v31  ;;  %v2575_v31 = vld [vmem:[#allocation8 + $0x38] sm:$0xff]  }
 0x8dd   : > { %1634 = vmatpush1.bf16.msra.mxu0 %v2518_v33  ;;  %v1404_v33 = vld [vmem:[%s3071_s11] sm:$0xf] }
 0x8de   : > { %1635 = vmatprep.subr.bf16.mxu0 %v2526_v35  ;;  %v1409_v35 = vrot.slane %v1404_v33, %v599_v47  ;;  %v1417_v36 = vrot.slane %v1404_v33, %v607_v49  ;;  %v1421_v38 = vrot.slane %v1404_v33, %v1420_v34 }
 0x8e1   : > { %1636 = vmatpush1.bf16.msra.mxu0 %v2524_v37  ;;  %v1413_v37 = vrot.slane %v1404_v33, %v603_v52 }
 0x8e2   : > { %1637 = vmatprep.subr.bf16.mxu0 %v2532_v39 }
 0x8e5   : > { %1638 = vmatpush1.bf16.msra.mxu0 %v2530_v41 }
 0x8e6   : > { %1639 = vmatprep.subr.bf16.mxu0 %v2538_v45 }
 0x8e9   : > { %1640 = vmatpush1.bf16.msra.mxu0 %v2536_v44 }
 0x8ea   : > { %1641 = vmatprep.subr.bf16.mxu0 %v2544_v50 }
 0x8ed   : > { %1642 = vmatpush1.bf16.msra.mxu0 %v2542_v53 }
 0x8ee   : > { %2324 = vmatprep.subr.bf16.mxu0 %v2546_v1 }
 0x966   : > { %v1344_v24 = vpop.xlane.xlu1 %1343 }
 0x967   : > { %v1345_v25 = vmul.f32 0.0078125, %v1344_v24  ;;  %v2569_v24 = vld [vmem:[#allocation8 + $0x70] sm:$0xff]  }
 0x969   : > { %v1346_v26 = vsub.f32 %v3026_v11, %v1345_v25  ;;  %v2570_v25 = vld [vmem:[#allocation8 + $0xf0] sm:$0xff]  }
 0x96b   : > { %v1347_v27 = vmul.f32 %v1346_v26, %v1346_v26 }
 0x96d   : > { %v1348_v28 = vsel %vm531_vm0, %v1347_v27, 0.0  ;;  %v2572_v27 = vld [vmem:[#allocation8 + $0xb0] sm:$0xff]  }
 0x96e   : > { %1349 = vadd.xlane.f32.xlu0 %v1348_v28  ;;  %v2573_v28 = vld [vmem:[#allocation8 + $0x78] sm:$0xff]  }
 0x9fb   : > { %v1350_v54 = vpop.xlane.xlu0 %1349 }
 0x9fc   : > { %v1351_v55 = vmul.f32 0.0078125, %v1350_v54 }
 0x9fe   : > { %v1352_v56 = vadd.f32 1e-05, %v1351_v55 }
 0xa00   : > { %2587 = vrsqrt.f32 %v1352_v56 }
 0xa0a   : > { %v2588_v57 = vpop.eup %2587 }
 0xa0b   : > { %v1354_v59 = vmul.f32 %v2588_v57, %v1346_v26  ;;  %v2571_v26 = vld [vmem:[#allocation8 + $0x30] sm:$0xff]  }
 0xa0d   : > { %v1362_v61 = vmul.f32 %v2203_v58, %v1354_v59 }
 0xa0f   : > { %v1370_v62 = vadd.f32 %v2204_v60, %v1362_v61 }
 0xa11   : > { %v1371_v63 = vpack.c.bf16 %v1370_v62, %v1370_v62 }
 0xa13   : > { %1619 = vmatmul.mubr.bf16.vlgmr.msra.gmra.mrb[12].mxu1 %v1371_v63  ;;  %1660 = vmatmul.mubr.bf16.vlgmr.msra.gmra.mrb[8].mxu0 %v1371_v63 }
 0xa14   : > { %2303 = vmatpush3.bf16.msra.mxu1 %v2547_v3  ;;  %2325 = vmatpush3.bf16.msra.mxu0 %v2548_v4 }
 0xa15   : > { %2304 = vmatprep.subr.bf16.mxu1 %v2549_v5  ;;  %2326 = vmatprep.subr.bf16.mxu0 %v2550_v7 }
 0xa18   : > { %2305 = vmatpush3.bf16.msra.mxu1 %v2551_v6  ;;  %2327 = vmatpush3.bf16.msra.mxu0 %v2552_v8 }
 0xa19   : > { %2306 = vmatprep.subr.bf16.mxu1 %v2553_v9  ;;  %2328 = vmatprep.subr.bf16.mxu0 %v2554_v10 }
 0xa1c   : > { %2307 = vmatpush3.bf16.msra.mxu1 %v2555_v12  ;;  %2329 = vmatpush3.bf16.msra.mxu0 %v2556_v13 }
 0xa1d   : > { %2308 = vmatprep.subr.bf16.mxu1 %v2557_v14  ;;  %2330 = vmatprep.subr.bf16.mxu0 %v2558_v15 }
 0xa20   : > { %2309 = vmatpush3.bf16.msra.mxu1 %v2559_v16  ;;  %2331 = vmatpush3.bf16.msra.mxu0 %v2560_v29 }
 0xa21   : > { %2310 = vmatprep.subr.bf16.mxu1 %v2561_v17  ;;  %2332 = vmatprep.subr.bf16.mxu0 %v2562_v18 }
 0xa24   : > { %2311 = vmatpush3.bf16.msra.mxu1 %v2563_v19  ;;  %2333 = vmatpush3.bf16.msra.mxu0 %v2564_v2 }
 0xa25   : > { %2312 = vmatprep.subr.bf16.mxu1 %v2565_v20  ;;  %2334 = vmatprep.subr.bf16.mxu0 %v2566_v21 }
 0xa28   : > { %2313 = vmatpush3.bf16.msra.mxu1 %v2567_v22  ;;  %2335 = vmatpush3.bf16.msra.mxu0 %v2568_v23 }
 0xa29   : > { %2314 = vmatprep.subr.bf16.mxu1 %v2569_v24  ;;  %2336 = vmatprep.subr.bf16.mxu0 %v2570_v25 }
 0xa2c   : > { %2315 = vmatpush3.bf16.msra.mxu1 %v2571_v26  ;;  %2337 = vmatpush3.bf16.msra.mxu0 %v2572_v27  ;;  %v2273_v26 = vld [vmem:[%s3089_s27] ss:$0 sm:$0xff] }
 0xa2d   : > { %2316 = vmatprep.subr.bf16.mxu1 %v2573_v28  ;;  %2338 = vmatprep.subr.bf16.mxu0 %v2574_v30 }
 0xa30   : > { %2317 = vmatpush3.bf16.msra.mxu1 %v2575_v31  ;;  %2339 = vmatpush3.bf16.msra.mxu0 %v2576_v32 }
 0xae6   : > { %v1620_v39 = vpop.f32.mrb[12].mxu1  ;;  %v1661_v40 = vpop.f32.mrb[8].mxu0 }
 0xae7   : > { %v1621_v41 = vadd.f32 %v1620_v39, %v1409_v35  ;;  %v1662_v42 = vadd.f32 %v1661_v40, %v1417_v36  ;;  %v1622_v43 = vpop.f32.mrb[13].mxu1  ;;  %v1663_v44 = vpop.f32.mrb[9].mxu0 }
 0xae8   : > { %v1623_v45 = vadd.f32 %v1622_v43, %v1413_v37  ;;  %v1664_v48 = vadd.f32 %v1663_v44, %v1421_v38  ;;  %v1624_v50 = vpop.f32.mrb[14].mxu1  ;;  %v1665_v51 = vpop.f32.mrb[10].mxu0 }
 0xae9   : > { %v2237_v53 = vmul.f32 -1.702, %v1621_v41  ;;  %v2239_v54 = vmul.f32 -1.702, %v1662_v42  ;;  %v1625_v47 = vpop.f32.mrb[15].mxu1  ;;  %v1666_v55 = vpop.f32.mrb[11].mxu0 }
 0xaea   : > { %v2238_v56 = vmul.f32 -1.702, %v1623_v45  ;;  %v2240_v49 = vmul.f32 -1.702, %v1664_v48 }
 0xaeb   : > { %v1676_v57 = vmul.f32 1.442695, %v2237_v53  ;;  %v1680_v46 = vmul.f32 1.442695, %v2239_v54 }
 0xaec   : > { %v1678_v52 = vmul.f32 1.442695, %v2238_v56  ;;  %v1682_v58 = vmul.f32 1.442695, %v2240_v49 }
 0xaed   : > { %2589 = vpow2.f32 %v1676_v57 }
 0xaee   : > { %2591 = vpow2.f32 %v1680_v46 }
 0xaef   : > { %2593 = vpow2.f32 %v1678_v52 }
 0xaf0   : > { %2595 = vpow2.f32 %v1682_v58 }
 0xaf7   : > { %v2590_v59 = vpop.eup %2589 }
 0xaf8   : > { %v2592_v60 = vpop.eup %2591  ;;  %v1684_v61 = vadd.f32 1.0, %v2590_v59 }
 0xaf9   : > { %v2594_v62 = vpop.eup %2593  ;;  %v1686_v63 = vadd.f32 1.0, %v2592_v60 }
 0xafa   : > { %v2596_v0 = vpop.eup %2595  ;;  %2597 = vrcp.f32 %v1684_v61  ;;  %v1685_v1 = vadd.f32 1.0, %v2594_v62 }
 0xafb   : > { %2599 = vrcp.f32 %v1686_v63  ;;  %v1687_v3 = vadd.f32 1.0, %v2596_v0 }
 0xafc   : > { %2601 = vrcp.f32 %v1685_v1 }
 0xafd   : > { %2603 = vrcp.f32 %v1687_v3 }
 0xb04   : > { %v2598_v4 = vpop.eup %2597 }
 0xb05   : > { %v2600_v5 = vpop.eup %2599  ;;  %v1696_v6 = vmul.f32 %v2598_v4, %v1621_v41 }
 0xb06   : > { %v2602_v7 = vpop.eup %2601  ;;  %v1698_v9 = vmul.f32 %v2600_v5, %v1662_v42 }
 0xb07   : > { %v2604_v8 = vpop.eup %2603  ;;  %v1697_v10 = vmul.f32 %v2602_v7, %v1623_v45  ;;  %v1700_v14 = vpack.c.bf16 %v1696_v6, %v1696_v6 }
 0xb08   : > { %v1699_v12 = vmul.f32 %v2604_v8, %v1664_v48  ;;  %v1702_v16 = vpack.c.bf16 %v1698_v9, %v1698_v9 }
 0xb09   : > { %v1701_v13 = vpack.c.bf16 %v1697_v10, %v1697_v10 }
 0xb0a   : > { %v1703_v15 = vpack.c.bf16 %v1699_v12, %v1699_v12 }
 0xb0b   : > { %1992 = vmatprep.mubr.bf16.mxu1 %v1701_v13 }
 0xb0c   : > { %2032 = vmatprep.mubr.bf16.mxu0 %v1703_v15  ;;  %1993 = vmatmul.mubr.bf16.vlgmr.msra.gmra.mrb[16].mxu1 %v1700_v14 }
 0xb0d   : > { %2033 = vmatmul.mubr.bf16.vlgmr.msra.gmra.mrb[12].mxu0 %v1702_v16 }
 0xbdf   : > { %v2318_v29 = vpop.f32.mrb[16].mxu1 }
 0xbe0   : > { %v2340_v17 = vpop.f32.mrb[12].mxu0  ;;  %v2319_v18 = vpop.f32.mrb[17].mxu1 }
 0xbe1   : > { %v2320_v19 = vadd.f32 %v2319_v18, %v2318_v29  ;;  %v2341_v2 = vpop.f32.mrb[13].mxu0  ;;  %v2321_v20 = vpop.f32.mrb[18].mxu1 }
 0xbe2   : > { %v2342_v21 = vadd.f32 %v2341_v2, %v2340_v17  ;;  %v2343_v22 = vpop.f32.mrb[14].mxu0  ;;  %v2322_v23 = vpop.f32.mrb[19].mxu1 }
 0xbe3   : > { %v2344_v24 = vpop.f32.mrb[15].mxu0 }
 0xbe4   : > { %v2035_v25 = vadd.f32 %v2342_v21, %v2320_v19 }
 0xbe6   : > { %v2040_v27 = vadd.f32 %v2035_v25, %v3026_v11 }
 0xbe8   : > { %v2048_v28 = vadd.f32 %v2273_v26, %v2040_v27 }
 0xbea   : > { %2049 = vst [vmem:[%s520_s15] sm:$0x3] %v2048_v28 }
 0xbeb PF: > { %s3091_s14 = sld [smem:[#allocation11_spill]] }
 0xbf1   : > { %s26_s29 = sadd.s32 1, %s3091_s14  }
 0xbf2   : > { %p23_p5 = scmp.ge.s32.totalorder %s26_s29, 6  }
 0xbf4   :  { %25 = sbr.rel (!%p23_p5) target bundleno = 5 (0x5), region = 122 }
 0xbfb   :  { %2069 = vsyncpa [#allocation5], 1 }
 0xbfc   :  { %2071 = vsyncpa [#allocation5 + $0x1], 1 }
 0xbfd   :  { %2072 = vsyncpa [#allocation7], 1 }

</bundles_post_ra>
